<compile_context>
chip_gen: v5e
topology: v5e:2x2
jax: 0.10.0
libtpu: 0.0.40
codegen_flags: <defaults>
</compile_context>

<pallas_src>
import jax
import jax.numpy as jnp
from jax.experimental import pallas as pl
from jax.experimental.pallas import tpu as pltpu

LAPLACIAN = ((-1.0, -1.0, -1.0), (-1.0, 8.0, -1.0), (-1.0, -1.0, -1.0))
GAUSSIAN = ((0.25, 0.5, 0.25), (0.5, 1.0, 0.5), (0.25, 0.5, 0.25))


def _vmem_budgets():
    """(vmem_limit_bytes, per-grid-step block budget) for the local TPU gen."""
    cap = 64 * 1024 * 1024          # conservative default (v7x per-core VMEM)
    try:
        cap = int(pltpu.get_tpu_info().vmem_capacity_bytes)
    except Exception:
        pass
    vmem_limit = min(int(cap * 0.78), 100 * 1024 * 1024)
    block_budget = int(cap * 0.30)
    return vmem_limit, block_budget


def _hf_kernel(hr_ref, sr_ref, out_ref):
    """One grid step: G 1-channel images -> (G, 2) = [lap L1 sum, gau L1 sum]."""
    d = hr_ref[...].astype(jnp.float32) - sr_ref[...].astype(jnp.float32)
    _, H, W = d.shape

    # Horizontal 3-tap pass via full-width lane rotations (XLU slot, no ragged
    # copies).  Wrapped border columns are masked out below.
    s = pltpu.roll(d, shift=1, axis=2) + pltpu.roll(d, shift=W - 1, axis=2)
    hb = s + d              # box row sum:       1, 1, 1
    hw = 0.5 * s + d        # gaussian row sum:  .5, 1, .5

    # Vertical 3-tap passes via sublane rotations (still full H).
    box = pltpu.roll(hb, shift=1, axis=1) + hb + pltpu.roll(hb, shift=H - 1, axis=1)
    gau = 0.5 * (pltpu.roll(hw, shift=1, axis=1) + pltpu.roll(hw, shift=H - 1, axis=1)) + hw
    lap = 9.0 * d - box     # laplacian = 9*center - box3x3

    # VALID-conv interior mask (rows/cols 1..size-2), built once per body.
    row = jax.lax.broadcasted_iota(jnp.int32, (1, H, W), 1)
    col = jax.lax.broadcasted_iota(jnp.int32, (1, H, W), 2)
    mask = ((row >= 1) & (row <= H - 2) &
            (col >= 1) & (col <= W - 2)).astype(jnp.float32)

    # L1 spatial sums: sublane reduce first, then a single lane reduce.
    la_sum = jnp.sum(jnp.sum(jnp.abs(lap) * mask, axis=1), axis=-1, keepdims=True)
    ga_sum = jnp.sum(jnp.sum(jnp.abs(gau) * mask, axis=1), axis=-1, keepdims=True)
    out_ref[0] = jnp.concatenate([la_sum, ga_sum], axis=-1)   # (G, 2)


def _pick_grouping(n, h, w, in_itemsize, block_budget):
    """Images-per-block G, block count (>=2 and even when possible), padded N."""
    # Per-image resident bytes: 2 inputs x 2 pipeline buffers (native dtype)
    # plus ~12 full-size f32 intermediates (d, s, hb, hw, box, gau, lap, roll
    # and abs/mask temporaries).
    per_image = h * w * (4 * in_itemsize + 12 * 4)
    g = int(max(1, min(block_budget // per_image, n)))
    if n >= 2:
        g = min(g, (n + 1) // 2)           # guarantee >= 2 grid blocks (megacore)
    n_blocks = -(-n // g)
    if n >= 2 and n_blocks % 2:            # prefer an even block count
        n_blocks += 1
        g = -(-n // n_blocks)
    return g, n_blocks, n_blocks * g


def high_frequency_loss(hr, sr):
    B, C, H, W = hr.shape
    assert C == 3, "HighFrequencyLoss expects 3-channel NCHW input"
    assert sr.shape == hr.shape
    N = B * C
    Ho, Wo = H - 2, W - 2

    vmem_limit, block_budget = _vmem_budgets()
    G, n_blocks, n_pad = _pick_grouping(N, H, W, hr.dtype.itemsize, block_budget)
    # TODO(synk): images whose G=1 working set exceeds the VMEM budget need
    # H-strip tiling (2-row halo, per-strip partial sums on an "arbitrary" axis).

    # Per-channel single-channel images; native dtype on the HBM wire; zero-pad
    # up to n_blocks*G images (padded images contribute |0| = 0 to the sums).
    hr1 = hr.reshape(N, H, W)
    sr1 = sr.reshape(N, H, W)
    if n_pad > N:
        pad = ((0, n_pad - N), (0, 0), (0, 0))
        hr1 = jnp.pad(hr1, pad)
        sr1 = jnp.pad(sr1, pad)

    sums = pl.pallas_call(
        _hf_kernel,
        out_shape=jax.ShapeDtypeStruct((n_blocks, G, 2), jnp.float32),
        grid=(n_blocks,),
        in_specs=[pl.BlockSpec((G, H, W), lambda n: (n, 0, 0)),
                  pl.BlockSpec((G, H, W), lambda n: (n, 0, 0))],
        out_specs=pl.BlockSpec((1, G, 2), lambda n: (n, 0, 0)),
        compiler_params=pltpu.CompilerParams(
            dimension_semantics=("parallel",),
            vmem_limit_bytes=vmem_limit),
    )(hr1, sr1)

    # Each of the 6 per-channel L1 means averages B*Ho*Wo elements and they are
    # summed, so total = (sum of all per-image L1 sums) / (B*Ho*Wo).
    return jnp.sum(sums) / jnp.float32(B * Ho * Wo)


def _reference_loss(hr, sr):
    """Pure-JAX reference replicating HighFrequencyLoss2.forward exactly."""
    lap = jnp.array(LAPLACIAN, jnp.float32).reshape(1, 1, 3, 3)
    gau = jnp.array(GAUSSIAN, jnp.float32).reshape(1, 1, 3, 3)

    def conv(x, k):
        return jax.lax.conv_general_dilated(
            x, k, window_strides=(1, 1), padding="VALID",
            dimension_numbers=("NCHW", "OIHW", "NCHW"))

    loss = jnp.float32(0.0)
    for c in range(3):
        hr_c = hr[:, c:c + 1].astype(jnp.float32)
        sr_c = sr[:, c:c + 1].astype(jnp.float32)
        loss = loss + jnp.mean(jnp.abs(conv(sr_c, lap) - conv(hr_c, lap)))
        loss = loss + jnp.mean(jnp.abs(conv(sr_c, gau) - conv(hr_c, gau)))
    return loss


if __name__ == "__main__":
    key = jax.random.PRNGKey(0)
    k_hr, k_sr = jax.random.split(key)
    # Small image crops; spatial = 128 matches the 128-lane vreg width.
    B, C, H, W = 2, 3, 128, 128
    hr = jax.random.uniform(k_hr, (B, C, H, W), jnp.float32)
    sr = jax.random.uniform(k_sr, (B, C, H, W), jnp.float32)

    loss = jax.block_until_ready(high_frequency_loss(hr, sr))
    ref = jax.block_until_ready(_reference_loss(hr, sr))
    assert jnp.allclose(loss, ref, rtol=1e-4, atol=1e-4), (loss, ref)
    print("KERNEL_OK")
</pallas_src>

<mosaic_0001>
module attributes {stable_mosaic.version = 11 : i64} {
  func.func @_hf_kernel(%arg0: i32, %arg1: memref<3x128x128xf32, #tpu.memory_space<vmem>>, %arg2: memref<3x128x128xf32, #tpu.memory_space<vmem>>, %arg3: memref<1x3x2xf32, #tpu.memory_space<vmem>>) attributes {dimension_semantics = [#tpu.dimension_semantics<parallel>], iteration_bounds = array<i64: 2>, scalar_prefetch = 0 : i64, scratch_operands = 0 : i64, tpu.core_type = #tpu.core_type<tc>, window_params = [{transform_indices = @transform_0, window_bounds = array<i64: 3, 128, 128>}, {transform_indices = @transform_1, window_bounds = array<i64: 3, 128, 128>}, {transform_indices = @transform_2, window_bounds = array<i64: 1, 3, 2>}]} {
    %c0 = arith.constant 0 : index
    %c0_0 = arith.constant 0 : index
    %c0_1 = arith.constant 0 : index
    %0 = vector.load %arg1[%c0, %c0_0, %c0_1] : memref<3x128x128xf32, #tpu.memory_space<vmem>>, vector<3x128x128xf32>
    %c0_2 = arith.constant 0 : index
    %c0_3 = arith.constant 0 : index
    %c0_4 = arith.constant 0 : index
    %1 = vector.load %arg2[%c0_2, %c0_3, %c0_4] : memref<3x128x128xf32, #tpu.memory_space<vmem>>, vector<3x128x128xf32>
    %2 = arith.subf %0, %1 : vector<3x128x128xf32>
    %c1_i32 = arith.constant 1 : i32
    %3 = tpu.dynamic_rotate %2 by %c1_i32 dim 2 : vector<3x128x128xf32>, i32 -> vector<3x128x128xf32>
    %c127_i32 = arith.constant 127 : i32
    %4 = tpu.dynamic_rotate %2 by %c127_i32 dim 2 : vector<3x128x128xf32>, i32 -> vector<3x128x128xf32>
    %5 = arith.addf %3, %4 : vector<3x128x128xf32>
    %6 = arith.addf %5, %2 : vector<3x128x128xf32>
    %cst = arith.constant 5.000000e-01 : f32
    %7 = vector.broadcast %cst : f32 to vector<3x128x128xf32>
    %8 = arith.mulf %7, %5 : vector<3x128x128xf32>
    %9 = arith.addf %8, %2 : vector<3x128x128xf32>
    %c1_i32_5 = arith.constant 1 : i32
    %10 = tpu.dynamic_rotate %6 by %c1_i32_5 dim 1 : vector<3x128x128xf32>, i32 -> vector<3x128x128xf32>
    %11 = arith.addf %10, %6 : vector<3x128x128xf32>
    %c127_i32_6 = arith.constant 127 : i32
    %12 = tpu.dynamic_rotate %6 by %c127_i32_6 dim 1 : vector<3x128x128xf32>, i32 -> vector<3x128x128xf32>
    %13 = arith.addf %11, %12 : vector<3x128x128xf32>
    %c1_i32_7 = arith.constant 1 : i32
    %14 = tpu.dynamic_rotate %9 by %c1_i32_7 dim 1 : vector<3x128x128xf32>, i32 -> vector<3x128x128xf32>
    %c127_i32_8 = arith.constant 127 : i32
    %15 = tpu.dynamic_rotate %9 by %c127_i32_8 dim 1 : vector<3x128x128xf32>, i32 -> vector<3x128x128xf32>
    %16 = arith.addf %14, %15 : vector<3x128x128xf32>
    %cst_9 = arith.constant 5.000000e-01 : f32
    %17 = vector.broadcast %cst_9 : f32 to vector<3x128x128xf32>
    %18 = arith.mulf %17, %16 : vector<3x128x128xf32>
    %19 = arith.addf %18, %9 : vector<3x128x128xf32>
    %cst_10 = arith.constant 9.000000e+00 : f32
    %20 = vector.broadcast %cst_10 : f32 to vector<3x128x128xf32>
    %21 = arith.mulf %20, %2 : vector<3x128x128xf32>
    %22 = arith.subf %21, %13 : vector<3x128x128xf32>
    %23 = tpu.iota {dimensions = array<i32: 1>} : vector<1x128x128xi32>
    %24 = tpu.iota {dimensions = array<i32: 2>} : vector<1x128x128xi32>
    %c1_i32_11 = arith.constant 1 : i32
    %25 = vector.broadcast %c1_i32_11 : i32 to vector<1x128x128xi32>
    %26 = arith.cmpi sge, %23, %25 : vector<1x128x128xi32>
    %c126_i32 = arith.constant 126 : i32
    %27 = vector.broadcast %c126_i32 : i32 to vector<1x128x128xi32>
    %28 = arith.cmpi sle, %23, %27 : vector<1x128x128xi32>
    %29 = arith.andi %26, %28 : vector<1x128x128xi1>
    %c1_i32_12 = arith.constant 1 : i32
    %30 = vector.broadcast %c1_i32_12 : i32 to vector<1x128x128xi32>
    %31 = arith.cmpi sge, %24, %30 : vector<1x128x128xi32>
    %32 = arith.andi %29, %31 : vector<1x128x128xi1>
    %c126_i32_13 = arith.constant 126 : i32
    %33 = vector.broadcast %c126_i32_13 : i32 to vector<1x128x128xi32>
    %34 = arith.cmpi sle, %24, %33 : vector<1x128x128xi32>
    %35 = arith.andi %32, %34 : vector<1x128x128xi1>
    %36 = arith.extui %35 : vector<1x128x128xi1> to vector<1x128x128xi32>
    %37 = arith.sitofp %36 : vector<1x128x128xi32> to vector<1x128x128xf32>
    %38 = math.absf %22 : vector<3x128x128xf32>
    %39 = vector.broadcast %37 : vector<1x128x128xf32> to vector<3x128x128xf32>
    %40 = arith.mulf %38, %39 : vector<3x128x128xf32>
    %cst_14 = arith.constant dense<0.000000e+00> : vector<3x128xf32>
    %41 = vector.multi_reduction <add>, %40, %cst_14 [1] : vector<3x128x128xf32> to vector<3x128xf32>
    %cst_15 = arith.constant dense<0.000000e+00> : vector<3xf32>
    %42 = vector.multi_reduction <add>, %41, %cst_15 [1] : vector<3x128xf32> to vector<3xf32>
    %43 = vector.shape_cast %42 : vector<3xf32> to vector<3x1xf32>
    %44 = math.absf %19 : vector<3x128x128xf32>
    %45 = vector.broadcast %37 : vector<1x128x128xf32> to vector<3x128x128xf32>
    %46 = arith.mulf %44, %45 : vector<3x128x128xf32>
    %cst_16 = arith.constant dense<0.000000e+00> : vector<3x128xf32>
    %47 = vector.multi_reduction <add>, %46, %cst_16 [1] : vector<3x128x128xf32> to vector<3x128xf32>
    %cst_17 = arith.constant dense<0.000000e+00> : vector<3xf32>
    %48 = vector.multi_reduction <add>, %47, %cst_17 [1] : vector<3x128xf32> to vector<3xf32>
    %49 = vector.shape_cast %48 : vector<3xf32> to vector<3x1xf32>
    %50 = tpu.concatenate %43, %49 in 1 : vector<3x1xf32>, vector<3x1xf32> -> vector<3x2xf32>
    %c0_18 = arith.constant 0 : index
    %c0_19 = arith.constant 0 : index
    %c0_20 = arith.constant 0 : index
    %51 = vector.load %arg3[%c0_18, %c0_19, %c0_20] : memref<1x3x2xf32, #tpu.memory_space<vmem>>, vector<1x3x2xf32>
    %52 = vector.shape_cast %51 : vector<1x3x2xf32> to vector<3x2xf32>
    %53 = vector.shape_cast %50 : vector<3x2xf32> to vector<1x3x2xf32>
    tpu.vector_store %arg3[%c0_18, %c0_19, %c0_20], %53 {strides = array<i32>} : memref<1x3x2xf32, #tpu.memory_space<vmem>>, vector<1x3x2xf32>,
    return
  }
  func.func @transform_0(%arg0: i32) -> (i32, i32, i32) {
    %c0_i32 = arith.constant 0 : i32
    %c0_i32_0 = arith.constant 0 : i32
    %c0_i32_1 = arith.constant 0 : i32
    return %arg0, %c0_i32, %c0_i32_0 : i32, i32, i32
  }
  func.func @transform_1(%arg0: i32) -> (i32, i32, i32) {
    %c0_i32 = arith.constant 0 : i32
    %c0_i32_0 = arith.constant 0 : i32
    %c0_i32_1 = arith.constant 0 : i32
    return %arg0, %c0_i32, %c0_i32_0 : i32, i32, i32
  }
  func.func @transform_2(%arg0: i32) -> (i32, i32, i32) {
    %c0_i32 = arith.constant 0 : i32
    %c0_i32_0 = arith.constant 0 : i32
    %c0_i32_1 = arith.constant 0 : i32
    return %arg0, %c0_i32, %c0_i32_0 : i32, i32, i32
  }
}

</mosaic_0001>

<bundles_post_ra>
// kernel: tpu_custom_call.1
= control target key start
LH: loop header
LB: loop body
LE: loop exit
PB: predicated region body
PF: predicated region fallthrough
CT: control target
= control target key end

     0   :  { %7 = vsyncpa [#allocation3], 0  ;;  %s4903_s0 = inlined_call_operand.hbm [shape: f32[6,128,128], index: 0, kind: input, shape index: {}]   ;;  %s4904_s1 = inlined_call_operand.hbm [shape: f32[6,128,128], index: 1, kind: input, shape index: {}]   ;;  %s4905_s2 = inlined_call_operand.vmem [shape: f32[2,3,2], index: 2, kind: output, shape index: {}]  }
   0x1   :  { %9 = vsyncpa [#allocation3 + $0x1], 0 }
   0x2   :  { %10 = vsyncpa [#allocation5], 0 }
   0x3   :  { %12 = vsyncpa [#allocation5 + $0x1], 0  ;;  %s2229_s9 = smov 0   ;;  %s2231_s10 = smov 0  }
   0x4   :  { %s2233_s11 = smov 0   ;;  %s2235_s12 = smov 0  }
   0x5 LB: > { %s2248_s13 = sadd.s32 4294967295, %s2207_s12   ;;  %s2251_s14 = sadd.s32 1, %s2207_s12   ;;  %s2207_s12 = sphi %s2235_s12, %s5301_s12   ;;  %s2203_s11 = sphi %s2233_s11, %s5300_s11   ;;  %s2199_s10 = sphi %s2231_s10, %s5299_s10   ;;  %s2195_s9 = sphi %s2229_s9, %s5298_s9  }
   0x6   : > { %s22_s15 = ssub.s32 %s2207_s12, %s2251_s14  ;;  %s25_s16 = sadd.s32 1, %s2203_s11 }
   0x7   : > { %p23_p0 = scmp.eq.s32.totalorder %s22_s15, 0  ;;  %p32_p1 = scmp.ne.s32.totalorder %s2203_s11, %s2199_s10 }
   0x8   : > { %p33_p2 = scmp.eq.s32.totalorder %s2207_s12, 0  ;;  %p38_p3 = scmp.ne.s32.totalorder %s2199_s10, %s2195_s9 }
   0x9   : > { %s2261_s17 = scalar_select %p23_p0, %s2203_s11, %s25_s16  }
   0xa   : > { %p34_p4 = por %p33_p2, %p32_p1  ;;  %p39_p5 = scmp.eq.s32.totalorder %s2248_s13, 0 }
   0xb   : > { %p2071_p6 = scmp.lt.s32.totalorder %s2207_s12, 2  ;;  %s2270_s19 = sand.u32 1, %s2203_s11  }
   0xc   : > { %p2265_p7 = por %p39_p5, %p38_p3  ;;  %s2057_s20 = smul.u32 384, %s2270_s19 }
   0xd   : > { %s2055_s21 = smul.u32 384, %s2207_s12  ;;  %p2274_p8 = pnand %p2071_p6, %p34_p4 }
   0xe   : > { %s118_s26 = scalar_lea.vmem [#allocation2], %s2057_s20  ;;  %p2031_p9 = scmp.ge.s32.totalorder %s2207_s12, 1 }
   0xf   : > { %s124_s25 = scalar_lea.hbm %s4903_s0, %s2055_s21  ;;  %s127_s27 = sshll.u32 %s118_s26, 4  ;;  %s128_s27 = int_to_ptr.vmem [resolvable:$true] %s127_s27 }
  0x10   : > { %s125_s28 = sshll.u32 %s124_s25, 4  ;;  %s115_s29 = scalar_lea.sflag [#allocation3], %s2270_s19  ;;  %s126_s28 = int_to_ptr.hbm [resolvable:$true] %s125_s28 }
  0x11   : > { %s2109_s30 = sshra.s32 %s126_s28, 4  ;;  %p2113_p11 = pneg %p2274_p8  ;;  %s2110_s30 = int_to_ptr.hbm [resolvable:$true] %s2109_s30 }
  0x12   : > { %s2111_s3 = scalar_lea.hbm %s2110_s30, 384  ;;  %s2116_s6 = scalar_lea.hbm %s4903_s0, 768 }
  0x13   : > { %p2112_p10 = scmp.ne.s32.totalorder %s2110_s30, %s2111_s3  ;;  %p2117_p0 = scmp.lt.s32.totalorder %s2110_s30, %s4903_s0 }
  0x14   : > { %p2118_p1 = scmp.lt.s32.totalorder %s2116_s6, %s2111_s3 }
  0x15   : > { %p2114_p12 = pnand %p2113_p11, %p2112_p10 }
  0x16   : > { %p2119_p2 = por %p2118_p1, %p2117_p0 }
  0x17   : > { %p2115_p13 = pneg %p2114_p12 }
  0x19   : > { %p2120_p3 = pnand %p2119_p2, %p2115_p13 }
  0x1b   : > { %2123 = shalt.err (!%p2120_p3)
}
  0x1c   : > { %s2209_s9 = smov 128   ;;  %s2210_s15 = smov 8  }
  0x1d   : > { %2067 = dma.hbm_to_vmem [thread:$0]  (!%p2274_p8), %s126_s28, 6144, %s128_s27, %s115_s29, %s2209_s9, %s2209_s9, %s2210_s15  }
  0x1e   : > { %p158_p4 = scmp.lt.s32.totalorder %s2207_s12, 3  ;;  %s147_s24 = scalar_lea.hbm %s4904_s1, %s2055_s21 }
  0x1f   : > { %s148_s26 = sshll.u32 %s147_s24, 4  ;;  %s141_s30 = scalar_lea.vmem [#allocation4], %s2057_s20  ;;  %s149_s26 = int_to_ptr.hbm [resolvable:$true] %s148_s26 }
  0x20   : > { %p2308_p5 = pnand %p2031_p9, %p158_p4  ;;  %s150_s3 = sshll.u32 %s141_s30, 4  ;;  %s151_s3 = int_to_ptr.vmem [resolvable:$true] %s150_s3 }
  0x21   : > { %s138_s4 = scalar_lea.sflag [#allocation5], %s2270_s19  ;;  %s2139_s5 = sshra.s32 %s149_s26, 4  ;;  %s2140_s5 = int_to_ptr.hbm [resolvable:$true] %s2139_s5 }
  0x22   : > { %s2141_s27 = scalar_lea.hbm %s2140_s5, 384  ;;  %s2146_s28 = scalar_lea.hbm %s4904_s1, 768 }
  0x23   : > { %p2142_p6 = scmp.ne.s32.totalorder %s2140_s5, %s2141_s27  ;;  %p2147_p9 = scmp.lt.s32.totalorder %s2140_s5, %s4904_s1 }
  0x24   : > { %p2148_p13 = scmp.lt.s32.totalorder %s2146_s28, %s2141_s27 }
  0x25   : > { %p2144_p10 = pnand %p2142_p6, %p2113_p11 }
  0x26   : > { %p2149_p0 = por %p2148_p13, %p2147_p9 }
  0x27   : > { %p2145_p12 = pneg %p2144_p10 }
  0x29   : > { %p2150_p1 = pnand %p2149_p0, %p2145_p12 }
  0x2b   : > { %2153 = shalt.err (!%p2150_p1)
}
  0x2c   : > { %2070 = dma.hbm_to_vmem [thread:$0]  (!%p2274_p8), %s149_s26, 6144, %s151_s3, %s138_s4, %s2209_s9, %s2209_s9, %s2210_s15  }
  0x2d   : > { %162 = sbr.rel (%p2308_p5) target bundleno = 754 (0x2f2), region = 28 }
  0x32   : > { %s164_s19 = sand.u32 1, %s2199_s10  }
  0x33   : > { %s2059_s20 = smul.u32 384, %s164_s19  ;;  %s165_s7 = scalar_lea.sflag [#allocation3], %s164_s19 }
  0x35   : > { %s2329_s8 = scalar_lea.vmem [#allocation2], %s2059_s20 }
  0x36   : > { %2186 = dma.done.wait (%p2265_p7), %s165_s7, 6144  }
  0x37   : > { %2188 = vsyncadd (%p2265_p7), %s165_s7, 4294961152  ;;  %s175_s16 = scalar_lea.sflag [#allocation5], %s164_s19  ;;  %s2335_s23 = scalar_lea.vmem [#allocation4], %s2059_s20 }
  0x38   : > { %2190 = dma.done.wait (%p2265_p7), %s175_s16, 6144  }
  0x39   : > { %2192 = vsyncadd (%p2265_p7), %s175_s16, 4294961152  ;;  %v214_v0 = vld [vmem:[%s2329_s8 + $0x20] sm:$0xff]  ;;  %v212_v2 = vld [vmem:[%s2329_s8 + $0x10] sm:$0xff]  ;;  %s2211_s18 = smov 1   ;;  %s2212_s22 = smov 127   ;;  %vm1755_vm11 = vcmask 1041409  }
  0x3a   : > { %v262_v1 = vld [vmem:[%s2335_s23 + $0x20] sm:$0xff]  ;;  %v260_v4 = vld [vmem:[%s2335_s23 + $0x10] sm:$0xff]  ;;  %v215_v9 = vld [vmem:[%s2329_s8 + $0x28] sm:$0xff]  ;;  %vm1757_vm12 = vcmask 1042434   ;;  %vm1760_vm13 = vcmask 1042432   ;;  %p206_p7 = scmp.lt.s32.totalorder %s2248_s13, 1 }
  0x3b   : > { %v2344_v3 = vsub.f32 %v214_v0, %v262_v1  ;;  %v210_v5 = vld [vmem:[%s2329_s8] sm:$0xff]  ;;  %v2349_v7 = vsub.f32 %v212_v2, %v260_v4  ;;  %v263_v10 = vld [vmem:[%s2335_s23 + $0x28] sm:$0xff]  ;;  %v213_v11 = vld [vmem:[%s2329_s8 + $0x18] sm:$0xff]  ;;  %vm1932_vm14 = vcmask 7168   ;;  %vm1934_vm15 = vcmask 10240  }
  0x3c   : > { %v258_v6 = vld [vmem:[%s2335_s23] sm:$0xff]  ;;  %v261_v12 = vld [vmem:[%s2335_s23 + $0x18] sm:$0xff]  ;;  %v211_v13 = vld [vmem:[%s2329_s8 + $0x8] sm:$0xff]  ;;  %v2365_v15 = vsub.f32 %v215_v9, %v263_v10  ;;  %s5303_s13 = smov (!%p206_p7, %s2248_s13), 1 }
  0x3d   : > { %v2351_v8 = vsub.f32 %v210_v5, %v258_v6  ;;  %362 = vrot.lane.b32.xlu2 %v2344_v3, %s2211_s18  ;;  %358 = vrot.lane.b32.xlu1 %v2349_v7, %s2211_s18  ;;  %v259_v14 = vld [vmem:[%s2335_s23 + $0x8] sm:$0xff]  ;;  %v2367_v16 = vsub.f32 %v213_v11, %v261_v12  ;;  %v218_v18 = vld [vmem:[%s2329_s8 + $0x40] sm:$0xff]  ;;  %s2032_s9 = sshll.u32 %s5303_s13, 2 }
  0x3e   : > { %5034 = vst [vmem:[#allocation8_spill] sm:$0xff] %v2365_v15  ;;  %v2369_v17 = vsub.f32 %v211_v13, %v259_v14  ;;  %v266_v19 = vld [vmem:[%s2335_s23 + $0x40] sm:$0xff]  ;;  %v217_v20 = vld [vmem:[%s2329_s8 + $0x38] sm:$0xff]  ;;  %v216_v22 = vld [vmem:[%s2329_s8 + $0x30] sm:$0xff]  ;;  %s209_s25 = scalar_lea.vmem %s4905_s2, %s2032_s9 }
  0x3f   : > { %354 = vrot.lane.b32.xlu0 %v2351_v8, %s2211_s18  ;;  %v265_v21 = vld [vmem:[%s2335_s23 + $0x38] sm:$0xff]  ;;  %v264_v23 = vld [vmem:[%s2335_s23 + $0x30] sm:$0xff]  ;;  %v2383_v24 = vsub.f32 %v218_v18, %v266_v19  ;;  %v219_v31 = vld [vmem:[%s2329_s8 + $0x48] sm:$0xff] }
  0x40   : > { %v2385_v25 = vsub.f32 %v217_v20, %v265_v21  ;;  %v2387_v26 = vsub.f32 %v216_v22, %v264_v23  ;;  %v221_v27 = vld [vmem:[%s2329_s8 + $0x58] sm:$0xff]  ;;  %v220_v29 = vld [vmem:[%s2329_s8 + $0x50] sm:$0xff]  ;;  %v267_v32 = vld [vmem:[%s2335_s23 + $0x48] sm:$0xff] }
  0x41   : > { %5035 = vst [vmem:[#allocation9_spill] sm:$0xff] %v2383_v24  ;;  %v269_v28 = vld [vmem:[%s2335_s23 + $0x58] sm:$0xff]  ;;  %v268_v30 = vld [vmem:[%s2335_s23 + $0x50] sm:$0xff]  ;;  %v2405_v35 = vsub.f32 %v219_v31, %v267_v32  ;;  %v223_v38 = vld [vmem:[%s2329_s8 + $0x68] sm:$0xff] }
  0x42   : > { %5036 = vst [vmem:[#allocation10_spill] sm:$0xff] %v2385_v25  ;;  %v2401_v33 = vsub.f32 %v221_v27, %v269_v28  ;;  %v2403_v34 = vsub.f32 %v220_v29, %v268_v30  ;;  %v224_v36 = vld [vmem:[%s2329_s8 + $0x70] sm:$0xff]  ;;  %v271_v39 = vld [vmem:[%s2335_s23 + $0x68] sm:$0xff]  ;;  %v222_v40 = vld [vmem:[%s2329_s8 + $0x60] sm:$0xff] }
  0x43   : > { %5037 = vst [vmem:[#allocation11_spill] sm:$0xff] %v2387_v26  ;;  %v272_v37 = vld [vmem:[%s2335_s23 + $0x70] sm:$0xff]  ;;  %v270_v41 = vld [vmem:[%s2335_s23 + $0x60] sm:$0xff]  ;;  %v2421_v43 = vsub.f32 %v223_v38, %v271_v39  ;;  %v227_v45 = vld [vmem:[%s2329_s8 + $0x88] sm:$0xff] }
  0x44   : > { %5038 = vst [vmem:[#allocation12_spill] sm:$0xff] %v2401_v33  ;;  %v2419_v42 = vsub.f32 %v224_v36, %v272_v37  ;;  %v2423_v44 = vsub.f32 %v222_v40, %v270_v41  ;;  %v275_v46 = vld [vmem:[%s2335_s23 + $0x88] sm:$0xff]  ;;  %v226_v47 = vld [vmem:[%s2329_s8 + $0x80] sm:$0xff]  ;;  %v225_v49 = vld [vmem:[%s2329_s8 + $0x78] sm:$0xff] }
  0x45   : > { %364 = vrot.lane.b32.xlu2 %v2365_v15, %s2211_s18  ;;  %360 = vrot.lane.b32.xlu1 %v2367_v16, %s2211_s18  ;;  %5039 = vst [vmem:[#allocation13_spill] sm:$0xff] %v2403_v34  ;;  %v274_v48 = vld [vmem:[%s2335_s23 + $0x80] sm:$0xff]  ;;  %v273_v50 = vld [vmem:[%s2335_s23 + $0x78] sm:$0xff]  ;;  %v2437_v51 = vsub.f32 %v227_v45, %v275_v46 }
  0x46   : > { %5040 = vst [vmem:[#allocation14_spill] sm:$0xff] %v2405_v35  ;;  %v2439_v52 = vsub.f32 %v226_v47, %v274_v48  ;;  %v2441_v53 = vsub.f32 %v225_v49, %v273_v50  ;;  %v230_v54 = vld [vmem:[%s2329_s8 + $0xa0] sm:$0xff]  ;;  %v229_v56 = vld [vmem:[%s2329_s8 + $0x98] sm:$0xff]  ;;  %v228_v58 = vld [vmem:[%s2329_s8 + $0x90] sm:$0xff] }
  0x47   : > { %356 = vrot.lane.b32.xlu0 %v2369_v17, %s2211_s18  ;;  %5041 = vst [vmem:[#allocation15_spill] sm:$0xff] %v2419_v42  ;;  %v278_v55 = vld [vmem:[%s2335_s23 + $0xa0] sm:$0xff]  ;;  %v277_v57 = vld [vmem:[%s2335_s23 + $0x98] sm:$0xff]  ;;  %v276_v59 = vld [vmem:[%s2335_s23 + $0x90] sm:$0xff] }
  0x48   : > { %5042 = vst [vmem:[#allocation16_spill] sm:$0xff] %v2421_v43  ;;  %v2455_v60 = vsub.f32 %v230_v54, %v278_v55  ;;  %v2457_v61 = vsub.f32 %v229_v56, %v277_v57  ;;  %v2459_v62 = vsub.f32 %v228_v58, %v276_v59  ;;  %v233_v63 = vld [vmem:[%s2329_s8 + $0xb8] sm:$0xff]  ;;  %v232_v1 = vld [vmem:[%s2329_s8 + $0xb0] sm:$0xff]  ;;  %v231_v4 = vld [vmem:[%s2329_s8 + $0xa8] sm:$0xff] }
  0x49   : > { %5043 = vst [vmem:[#allocation17_spill] sm:$0xff] %v2423_v44  ;;  %v281_v0 = vld [vmem:[%s2335_s23 + $0xb8] sm:$0xff]  ;;  %v280_v2 = vld [vmem:[%s2335_s23 + $0xb0] sm:$0xff]  ;;  %v279_v5 = vld [vmem:[%s2335_s23 + $0xa8] sm:$0xff] }
  0x4a   : > { %5044 = vst [vmem:[#allocation18_spill] sm:$0xff] %v2441_v53  ;;  %v2473_v6 = vsub.f32 %v233_v63, %v281_v0  ;;  %v2475_v9 = vsub.f32 %v232_v1, %v280_v2  ;;  %v2477_v10 = vsub.f32 %v231_v4, %v279_v5  ;;  %v236_v11 = vld [vmem:[%s2329_s8 + $0xd0] sm:$0xff]  ;;  %v235_v13 = vld [vmem:[%s2329_s8 + $0xc8] sm:$0xff]  ;;  %v234_v18 = vld [vmem:[%s2329_s8 + $0xc0] sm:$0xff] }
  0x4b   : > { %5045 = vst [vmem:[#allocation19_spill] sm:$0xff] %v2457_v61  ;;  %v284_v12 = vld [vmem:[%s2335_s23 + $0xd0] sm:$0xff]  ;;  %v283_v14 = vld [vmem:[%s2335_s23 + $0xc8] sm:$0xff]  ;;  %v282_v19 = vld [vmem:[%s2335_s23 + $0xc0] sm:$0xff] }
  0x4c   : > { %5046 = vst [vmem:[#allocation20_spill] sm:$0xff] %v2473_v6  ;;  %v2491_v20 = vsub.f32 %v236_v11, %v284_v12  ;;  %v2493_v21 = vsub.f32 %v235_v13, %v283_v14  ;;  %v2495_v22 = vsub.f32 %v234_v18, %v282_v19  ;;  %v239_v23 = vld [vmem:[%s2329_s8 + $0xe8] sm:$0xff]  ;;  %v238_v28 = vld [vmem:[%s2329_s8 + $0xe0] sm:$0xff]  ;;  %v237_v30 = vld [vmem:[%s2329_s8 + $0xd8] sm:$0xff] }
  0x4d   : > { %370 = vrot.lane.b32.xlu2 %v2383_v24, %s2211_s18  ;;  %368 = vrot.lane.b32.xlu1 %v2385_v25, %s2211_s18  ;;  %5047 = vst [vmem:[#allocation21_spill] sm:$0xff] %v2475_v9  ;;  %v287_v27 = vld [vmem:[%s2335_s23 + $0xe8] sm:$0xff]  ;;  %v286_v29 = vld [vmem:[%s2335_s23 + $0xe0] sm:$0xff] }
  0x4e   : > { %5048 = vst [vmem:[#allocation22_spill] sm:$0xff] %v2477_v10  ;;  %v285_v31 = vld [vmem:[%s2335_s23 + $0xd8] sm:$0xff]  ;;  %v2509_v32 = vsub.f32 %v239_v23, %v287_v27  ;;  %v2511_v36 = vsub.f32 %v238_v28, %v286_v29  ;;  %v242_v38 = vld [vmem:[%s2329_s8 + $0x100] sm:$0xff]  ;;  %v240_v45 = vld [vmem:[%s2329_s8 + $0xf0] sm:$0xff] }
  0x4f   : > { %366 = vrot.lane.b32.xlu0 %v2387_v26, %s2211_s18  ;;  %5049 = vst [vmem:[#allocation23_spill] sm:$0xff] %v2491_v20  ;;  %v2513_v37 = vsub.f32 %v237_v30, %v285_v31  ;;  %v290_v39 = vld [vmem:[%s2335_s23 + $0x100] sm:$0xff]  ;;  %v241_v40 = vld [vmem:[%s2329_s8 + $0xf8] sm:$0xff]  ;;  %v288_v46 = vld [vmem:[%s2335_s23 + $0xf0] sm:$0xff] }
  0x50   : > { %5050 = vst [vmem:[#allocation24_spill] sm:$0xff] %v2493_v21  ;;  %v289_v41 = vld [vmem:[%s2335_s23 + $0xf8] sm:$0xff]  ;;  %v2527_v47 = vsub.f32 %v242_v38, %v290_v39  ;;  %v2531_v49 = vsub.f32 %v240_v45, %v288_v46  ;;  %v244_v55 = vld [vmem:[%s2329_s8 + $0x110] sm:$0xff]  ;;  %v243_v57 = vld [vmem:[%s2329_s8 + $0x108] sm:$0xff] }
  0x51   : > { %5051 = vst [vmem:[#allocation25_spill] sm:$0xff] %v2495_v22  ;;  %v2529_v48 = vsub.f32 %v241_v40, %v289_v41  ;;  %v245_v50 = vld [vmem:[%s2329_s8 + $0x118] sm:$0xff]  ;;  %v292_v56 = vld [vmem:[%s2335_s23 + $0x110] sm:$0xff]  ;;  %v291_v58 = vld [vmem:[%s2335_s23 + $0x108] sm:$0xff] }
  0x52   : > { %5052 = vst [vmem:[#allocation26_spill] sm:$0xff] %v2509_v32  ;;  %v293_v54 = vld [vmem:[%s2335_s23 + $0x118] sm:$0xff]  ;;  %v2547_v63 = vsub.f32 %v244_v55, %v292_v56  ;;  %v2549_v0 = vsub.f32 %v243_v57, %v291_v58  ;;  %v248_v1 = vld [vmem:[%s2329_s8 + $0x130] sm:$0xff]  ;;  %v247_v4 = vld [vmem:[%s2329_s8 + $0x128] sm:$0xff] }
  0x53   : > { %5053 = vst [vmem:[#allocation27_spill] sm:$0xff] %v2511_v36  ;;  %v2545_v59 = vsub.f32 %v245_v50, %v293_v54  ;;  %v296_v2 = vld [vmem:[%s2335_s23 + $0x130] sm:$0xff]  ;;  %v295_v11 = vld [vmem:[%s2335_s23 + $0x128] sm:$0xff]  ;;  %v246_v12 = vld [vmem:[%s2329_s8 + $0x120] sm:$0xff] }
  0x54   : > { %5054 = vst [vmem:[#allocation28_spill] sm:$0xff] %v2513_v37  ;;  %v294_v13 = vld [vmem:[%s2335_s23 + $0x120] sm:$0xff]  ;;  %v2565_v14 = vsub.f32 %v248_v1, %v296_v2  ;;  %v2567_v18 = vsub.f32 %v247_v4, %v295_v11  ;;  %v251_v23 = vld [vmem:[%s2329_s8 + $0x148] sm:$0xff]  ;;  %v249_v31 = vld [vmem:[%s2329_s8 + $0x138] sm:$0xff] }
  0x55   : > { %376 = vrot.lane.b32.xlu2 %v2401_v33, %s2211_s18  ;;  %374 = vrot.lane.b32.xlu1 %v2403_v34, %s2211_s18  ;;  %5055 = vst [vmem:[#allocation29_spill] sm:$0xff] %v2527_v47  ;;  %v2569_v19 = vsub.f32 %v246_v12, %v294_v13  ;;  %v299_v27 = vld [vmem:[%s2335_s23 + $0x148] sm:$0xff]  ;;  %v250_v28 = vld [vmem:[%s2329_s8 + $0x140] sm:$0xff] }
  0x56   : > { %5056 = vst [vmem:[#allocation30_spill] sm:$0xff] %v2529_v48  ;;  %v298_v30 = vld [vmem:[%s2335_s23 + $0x140] sm:$0xff]  ;;  %v297_v38 = vld [vmem:[%s2335_s23 + $0x138] sm:$0xff]  ;;  %v2585_v39 = vsub.f32 %v251_v23, %v299_v27  ;;  %v252_v56 = vld [vmem:[%s2329_s8 + $0x150] sm:$0xff] }
  0x57   : > { %372 = vrot.lane.b32.xlu0 %v2405_v35, %s2211_s18  ;;  %5057 = vst [vmem:[#allocation31_spill] sm:$0xff] %v2531_v49  ;;  %v2587_v40 = vsub.f32 %v250_v28, %v298_v30  ;;  %v2589_v41 = vsub.f32 %v249_v31, %v297_v38  ;;  %v254_v45 = vld [vmem:[%s2329_s8 + $0x160] sm:$0xff]  ;;  %v253_v50 = vld [vmem:[%s2329_s8 + $0x158] sm:$0xff]  ;;  %v300_v57 = vld [vmem:[%s2335_s23 + $0x150] sm:$0xff] }
  0x58   : > { %5058 = vst [vmem:[#allocation32_spill] sm:$0xff] %v2545_v59  ;;  %v302_v46 = vld [vmem:[%s2335_s23 + $0x160] sm:$0xff]  ;;  %v301_v55 = vld [vmem:[%s2335_s23 + $0x158] sm:$0xff]  ;;  %v2609_v2 = vsub.f32 %v252_v56, %v300_v57  ;;  %v256_v12 = vld [vmem:[%s2329_s8 + $0x170] sm:$0xff] }
  0x59   : > { %5059 = vst [vmem:[#allocation33_spill] sm:$0xff] %v2549_v0  ;;  %v2605_v58 = vsub.f32 %v254_v45, %v302_v46  ;;  %v2607_v1 = vsub.f32 %v253_v50, %v301_v55  ;;  %v257_v4 = vld [vmem:[%s2329_s8 + $0x178] sm:$0xff]  ;;  %v304_v23 = vld [vmem:[%s2335_s23 + $0x170] sm:$0xff]  ;;  %v255_v27 = vld [vmem:[%s2329_s8 + $0x168] sm:$0xff] }
  0x5a   : > { %5060 = vst [vmem:[#allocation34_spill] sm:$0xff] %v2569_v19  ;;  %v305_v11 = vld [vmem:[%s2335_s23 + $0x178] sm:$0xff]  ;;  %v303_v28 = vld [vmem:[%s2335_s23 + $0x168] sm:$0xff]  ;;  %v2631_v45 = vsub.f32 %v256_v12, %v304_v23 }
  0x5b   : > { %5061 = vst [vmem:[#allocation35_spill] sm:$0xff] %v2585_v39  ;;  %v2629_v38 = vsub.f32 %v257_v4, %v305_v11  ;;  %v2633_v46 = vsub.f32 %v255_v27, %v303_v28 }
  0x5c   : > { %5062 = vst [vmem:[#allocation36_spill] sm:$0xff] %v2587_v40 }
  0x5d   : > { %382 = vrot.lane.b32.xlu2 %v2419_v42, %s2211_s18  ;;  %380 = vrot.lane.b32.xlu1 %v2421_v43, %s2211_s18  ;;  %5063 = vst [vmem:[#allocation37_spill] sm:$0xff] %v2589_v41 }
  0x5e   : > { %5065 = vst [vmem:[#allocation39_spill] sm:$0xff] %v2605_v58 }
  0x5f   : > { %378 = vrot.lane.b32.xlu0 %v2423_v44, %s2211_s18  ;;  %5066 = vst [vmem:[#allocation40_spill] sm:$0xff] %v2607_v1 }
  0x60   : > { %5067 = vst [vmem:[#allocation41_spill] sm:$0xff] %v2609_v2 }
  0x61   : > { %5069 = vst [vmem:[#allocation43_spill] sm:$0xff] %v2629_v38 }
  0x62   : > { %5070 = vst [vmem:[#allocation44_spill] sm:$0xff] %v2631_v45 }
  0x63   : > { %5071 = vst [vmem:[#allocation45_spill] sm:$0xff] %v2633_v46 }
  0x65   : > { %388 = vrot.lane.b32.xlu2 %v2437_v51, %s2211_s18  ;;  %386 = vrot.lane.b32.xlu1 %v2439_v52, %s2211_s18 }
  0x67   : > { %384 = vrot.lane.b32.xlu0 %v2441_v53, %s2211_s18 }
  0x6d   : > { %394 = vrot.lane.b32.xlu2 %v2455_v60, %s2211_s18  ;;  %392 = vrot.lane.b32.xlu1 %v2457_v61, %s2211_s18 }
  0x6f   : > { %390 = vrot.lane.b32.xlu0 %v2459_v62, %s2211_s18 }
  0x75   : > { %400 = vrot.lane.b32.xlu2 %v2473_v6, %s2211_s18  ;;  %398 = vrot.lane.b32.xlu1 %v2475_v9, %s2211_s18 }
  0x77   : > { %396 = vrot.lane.b32.xlu0 %v2477_v10, %s2211_s18 }
  0x7d   : > { %406 = vrot.lane.b32.xlu2 %v2491_v20, %s2211_s18  ;;  %404 = vrot.lane.b32.xlu1 %v2493_v21, %s2211_s18 }
  0x7f   : > { %402 = vrot.lane.b32.xlu0 %v2495_v22, %s2211_s18 }
  0x85   : > { %412 = vrot.lane.b32.xlu2 %v2509_v32, %s2211_s18  ;;  %410 = vrot.lane.b32.xlu1 %v2511_v36, %s2211_s18 }
  0x87   : > { %408 = vrot.lane.b32.xlu0 %v2513_v37, %s2211_s18 }
  0x8d   : > { %418 = vrot.lane.b32.xlu2 %v2527_v47, %s2211_s18  ;;  %416 = vrot.lane.b32.xlu1 %v2529_v48, %s2211_s18 }
  0x8f   : > { %414 = vrot.lane.b32.xlu0 %v2531_v49, %s2211_s18 }
  0x95   : > { %424 = vrot.lane.b32.xlu2 %v2545_v59, %s2211_s18  ;;  %422 = vrot.lane.b32.xlu1 %v2547_v63, %s2211_s18 }
  0x97   : > { %420 = vrot.lane.b32.xlu0 %v2549_v0, %s2211_s18  ;;  %v2560_v5 = vpop.permute.xlu2 %362 }
  0x9d   : > { %430 = vrot.lane.b32.xlu2 %v2565_v14, %s2211_s18  ;;  %428 = vrot.lane.b32.xlu1 %v2567_v18, %s2211_s18 }
  0x9f   : > { %426 = vrot.lane.b32.xlu0 %v2569_v19, %s2211_s18  ;;  %v2580_v29 = vpop.permute.xlu2 %364 }
  0xa5   : > { %436 = vrot.lane.b32.xlu2 %v2585_v39, %s2211_s18  ;;  %434 = vrot.lane.b32.xlu1 %v2587_v40, %s2211_s18 }
  0xa7   : > { %432 = vrot.lane.b32.xlu0 %v2589_v41, %s2211_s18  ;;  %v2600_v54 = vpop.permute.xlu2 %370 }
  0xa8   : > { %5064 = vst [vmem:[#allocation38_spill] sm:$0xff] %v2600_v54 }
  0xad   : > { %442 = vrot.lane.b32.xlu2 %v2605_v58, %s2211_s18  ;;  %440 = vrot.lane.b32.xlu1 %v2607_v1, %s2211_s18 }
  0xaf   : > { %438 = vrot.lane.b32.xlu0 %v2609_v2, %s2211_s18  ;;  %v2620_v13 = vpop.permute.xlu2 %376  ;;  %v2625_v30 = vpop.permute.xlu1 %358 }
  0xb0   : > { %5068 = vst [vmem:[#allocation42_spill] sm:$0xff] %v2620_v13 }
  0xb1   : > { %v2627_v31 = vpop.permute.xlu0 %354 }
  0xb5   : > { %448 = vrot.lane.b32.xlu2 %v2629_v38, %s2211_s18  ;;  %446 = vrot.lane.b32.xlu1 %v2631_v45, %s2211_s18 }
  0xb7   : > { %444 = vrot.lane.b32.xlu0 %v2633_v46, %s2211_s18  ;;  %v2641_v50 = vpop.permute.xlu2 %382  ;;  %v2643_v55 = vpop.permute.xlu1 %360 }
  0xb8   : > { %5072 = vst [vmem:[#allocation46_spill] sm:$0xff] %v2641_v50 }
  0xb9   : > { %v2645_v56 = vpop.permute.xlu0 %356 }
  0xbd   : > { %454 = vrot.lane.b32.xlu2 %v2349_v7, %s2212_s22  ;;  %452 = vrot.lane.b32.xlu1 %v2369_v17, %s2212_s22 }
  0xbf   : > { %450 = vrot.lane.b32.xlu0 %v2351_v8, %s2212_s22  ;;  %v2653_v57 = vpop.permute.xlu2 %388  ;;  %v2655_v4 = vpop.permute.xlu1 %368 }
  0xc0   : > { %5073 = vst [vmem:[#allocation47_spill] sm:$0xff] %v2655_v4 }
  0xc1   : > { %v2657_v11 = vpop.permute.xlu0 %366 }
  0xc2   : > { %5074 = vst [vmem:[#allocation48_spill] sm:$0xff] %v2657_v11 }
  0xc5   : > { %460 = vrot.lane.b32.xlu2 %v2365_v15, %s2212_s22  ;;  %458 = vrot.lane.b32.xlu1 %v2344_v3, %s2212_s22 }
  0xc7   : > { %456 = vrot.lane.b32.xlu0 %v2367_v16, %s2212_s22  ;;  %v2665_v12 = vpop.permute.xlu2 %394  ;;  %v2667_v23 = vpop.permute.xlu1 %374 }
  0xc8   : > { %5075 = vst [vmem:[#allocation49_spill] sm:$0xff] %v2667_v23 }
  0xc9   : > { %v2669_v27 = vpop.permute.xlu0 %372 }
  0xca   : > { %5076 = vst [vmem:[#allocation50_spill] sm:$0xff] %v2669_v27 }
  0xcd   : > { %484 = vrot.lane.b32.xlu2 %v2437_v51, %s2212_s22  ;;  %482 = vrot.lane.b32.xlu1 %v2439_v52, %s2212_s22 }
  0xcf   : > { %480 = vrot.lane.b32.xlu0 %v2441_v53, %s2212_s22  ;;  %v2677_v28 = vpop.permute.xlu2 %400  ;;  %v2679_v50 = vpop.permute.xlu1 %380 }
  0xd0   : > { %5077 = vst [vmem:[#allocation51_spill] sm:$0xff] %v2677_v28 }
  0xd1   : > { %5078 = vst [vmem:[#allocation52_spill] sm:$0xff] %v2679_v50  ;;  %v2681_v13 = vpop.permute.xlu0 %378 }
  0xd2   : > { %5079 = vst [vmem:[#allocation53_spill] sm:$0xff] %v2681_v13 }
  0xd5   : > { %514 = vrot.lane.b32.xlu2 %v2527_v47, %s2212_s22  ;;  %512 = vrot.lane.b32.xlu1 %v2529_v48, %s2212_s22 }
  0xd7   : > { %486 = vrot.lane.b32.xlu0 %v2459_v62, %s2212_s22  ;;  %v2689_v23 = vpop.permute.xlu2 %406  ;;  %v2691_v27 = vpop.permute.xlu1 %386 }
  0xd8   : > { %5080 = vst [vmem:[#allocation54_spill] sm:$0xff] %v2689_v23 }
  0xd9   : > { %v2693_v54 = vpop.permute.xlu0 %384 }
  0xdd   : > { %544 = vrot.lane.b32.xlu2 %v2629_v38, %s2212_s22  ;;  %518 = vrot.lane.b32.xlu1 %v2547_v63, %s2212_s22 }
  0xdf   : > { %516 = vrot.lane.b32.xlu0 %v2549_v0, %s2212_s22  ;;  %v2701_v50 = vpop.permute.xlu2 %412  ;;  %v2703_v13 = vpop.permute.xlu1 %392 }
  0xe0   : > { %5081 = vst [vmem:[#allocation55_spill] sm:$0xff] %v2701_v50 }
  0xe1   : > { %5082 = vst [vmem:[#allocation56_spill] sm:$0xff] %v2703_v13  ;;  %v2705_v4 = vpop.permute.xlu0 %390 }
  0xe5   : > { %490 = vrot.lane.b32.xlu2 %v2455_v60, %s2212_s22  ;;  %520 = vrot.lane.b32.xlu1 %v2545_v59, %s2212_s22 }
  0xe7   : > { %488 = vrot.lane.b32.xlu0 %v2457_v61, %s2212_s22  ;;  %v2713_v23 = vpop.permute.xlu2 %418  ;;  %v2715_v28 = vpop.permute.xlu1 %398 }
  0xe8   : > { %5083 = vst [vmem:[#allocation57_spill] sm:$0xff] %v2715_v28 }
  0xe9   : > { %v2717_v11 = vpop.permute.xlu0 %396 }
  0xea   : > { %5084 = vst [vmem:[#allocation58_spill] sm:$0xff] %v2717_v11 }
  0xed   : > { %524 = vrot.lane.b32.xlu2 %v2567_v18, %s2212_s22  ;;  %492 = vrot.lane.b32.xlu1 %v2477_v10, %s2212_s22 }
  0xef   : > { %522 = vrot.lane.b32.xlu0 %v2569_v19, %s2212_s22  ;;  %v2725_v50 = vpop.permute.xlu2 %424  ;;  %v2727_v13 = vpop.permute.xlu1 %404 }
  0xf0   : > { %5085 = vst [vmem:[#allocation59_spill] sm:$0xff] %v2725_v50 }
  0xf1   : > { %5086 = vst [vmem:[#allocation60_spill] sm:$0xff] %v2727_v13  ;;  %v2729_v61 = vpop.permute.xlu0 %402 }
  0xf2   : > { %5087 = vst [vmem:[#allocation61_spill] sm:$0xff] %v2729_v61 }
  0xf5   : > { %526 = vrot.lane.b32.xlu2 %v2565_v14, %s2212_s22  ;;  %494 = vrot.lane.b32.xlu1 %v2475_v9, %s2212_s22 }
  0xf7   : > { %462 = vrot.lane.b32.xlu0 %v2387_v26, %s2212_s22  ;;  %v2737_v28 = vpop.permute.xlu2 %430  ;;  %v2739_v10 = vpop.permute.xlu1 %410 }
  0xf8   : > { %5088 = vst [vmem:[#allocation62_spill] sm:$0xff] %v2739_v10 }
  0xf9   : > { %v2741_v19 = vpop.permute.xlu0 %408 }
  0xfa   : > { %5089 = vst [vmem:[#allocation63_spill] sm:$0xff] %v2741_v19 }
  0xfd   : > { %528 = vrot.lane.b32.xlu2 %v2589_v41, %s2212_s22  ;;  %496 = vrot.lane.b32.xlu1 %v2473_v6, %s2212_s22 }
  0xff   : > { %464 = vrot.lane.b32.xlu0 %v2385_v25, %s2212_s22  ;;  %v2749_v13 = vpop.permute.xlu2 %436  ;;  %v2751_v61 = vpop.permute.xlu1 %416 }
 0x100   : > { %5090 = vst [vmem:[#allocation64_spill] sm:$0xff] %v2749_v13 }
 0x101   : > { %v2753_v26 = vpop.permute.xlu0 %414 }
 0x102   : > { %5091 = vst [vmem:[#allocation65_spill] sm:$0xff] %v2753_v26 }
 0x105   : > { %530 = vrot.lane.b32.xlu2 %v2587_v40, %s2212_s22  ;;  %498 = vrot.lane.b32.xlu1 %v2495_v22, %s2212_s22 }
 0x107   : > { %466 = vrot.lane.b32.xlu0 %v2383_v24, %s2212_s22  ;;  %v2761_v10 = vpop.permute.xlu2 %442  ;;  %v2763_v19 = vpop.permute.xlu1 %422 }
 0x108   : > { %5092 = vst [vmem:[#allocation66_spill] sm:$0xff] %v2761_v10 }
 0x109   : > { %v2765_v25 = vpop.permute.xlu0 %420 }
 0x10a   : > { %5093 = vst [vmem:[#allocation67_spill] sm:$0xff] %v2765_v25 }
 0x10d   : > { %532 = vrot.lane.b32.xlu2 %v2585_v39, %s2212_s22  ;;  %500 = vrot.lane.b32.xlu1 %v2493_v21, %s2212_s22 }
 0x10f   : > { %468 = vrot.lane.b32.xlu0 %v2405_v35, %s2212_s22  ;;  %v2773_v26 = vpop.permute.xlu2 %448  ;;  %v2775_v22 = vpop.permute.xlu1 %428 }
 0x111   : > { %v2777_v24 = vpop.permute.xlu0 %426 }
 0x112   : > { %5094 = vst [vmem:[#allocation68_spill] sm:$0xff] %v2777_v24 }
 0x115   : > { %534 = vrot.lane.b32.xlu2 %v2609_v2, %s2212_s22  ;;  %502 = vrot.lane.b32.xlu1 %v2491_v20, %s2212_s22 }
 0x117   : > { %470 = vrot.lane.b32.xlu0 %v2403_v34, %s2212_s22  ;;  %v455_v10 = vpop.permute.xlu2 %454  ;;  %v2785_v21 = vpop.permute.xlu1 %434  ;;  %v786_v34 = vlaneseq }
 0x118   : > { %5095 = vst [vmem:[#allocation69_spill] sm:$0xff] %v2785_v21  ;;  %v548_v9 = vadd.f32 %v455_v10, %v2625_v30 }
 0x119   : > { %v2787_v6 = vpop.permute.xlu0 %432  ;;  %v2800_v39 = vand.u32 127, %v786_v34  ;;  %v2815_v10 = vshrl.u32 %v786_v34, 7  ;;  %v2864_v34 = vmul.f32 9.0, %v2367_v16 }
 0x11a   : > { %5096 = vst [vmem:[#allocation70_spill] sm:$0xff] %v2787_v6 }
 0x11b   : > { %5099 = vst [vmem:[#allocation73_spill] sm:$0xff] %v2800_v39  ;;  %vm1527_vm0 = vcmp.ge.s32.totalorder %v2800_v39, 1  ;;  %vm1544_vm1 = vcmp.le.s32.totalorder %v2800_v39, 126  ;;  %vm788_vm3 = vcmp.lt.s32.totalorder %v2815_v10, 1  ;;  %vm933_vm4 = vcmp.lt.s32.totalorder %v2815_v10, 7 }
 0x11c   : > { %vm1546_vm2 = vmand %vm1527_vm0, %vm1544_vm1  ;;  %vm1479_vm5 = vcmp.ge.s32.totalorder %v2815_v10, 1 }
 0x11d   : > { %536 = vrot.lane.b32.xlu2 %v2607_v1, %s2212_s22  ;;  %504 = vrot.lane.b32.xlu1 %v2513_v37, %s2212_s22  ;;  %vm1528_vm6 = vmand %vm1479_vm5, %vm1527_vm0 }
 0x11e   : > { %vm1545_vm7 = vmand %vm1528_vm6, %vm1544_vm1 }
 0x11f   : > { %472 = vrot.lane.b32.xlu0 %v2401_v33, %s2212_s22  ;;  %v461_v35 = vpop.permute.xlu2 %460  ;;  %v2795_v2 = vpop.permute.xlu1 %440  ;;  %v644_v33 = vmul.f32 0.5, %v548_v9 }
 0x120   : > { %5097 = vst [vmem:[#allocation71_spill] sm:$0xff] %v2795_v2  ;;  %v551_v1 = vadd.f32 %v461_v35, %v2580_v29  ;;  %v2818_v35 = vadd.f32 %v548_v9, %v2349_v7  ;;  %v2867_v9 = vmul.f32 9.0, %v2344_v3 }
 0x121   : > { %v2797_v20 = vpop.permute.xlu0 %438  ;;  %v2821_v30 = vadd.f32 %v644_v33, %v2349_v7  ;;  %v2836_v33 = vmul.f32 9.0, %v2369_v17 }
 0x122   : > { %5098 = vst [vmem:[#allocation72_spill] sm:$0xff] %v2797_v20  ;;  %v647_v29 = vmul.f32 0.5, %v551_v1 }
 0x123   : > { %v5109_v50 = vrot.slane %v2821_v30, 7  ;;  %v5110_v41 = vrot.slane %v2821_v30, 1 }
 0x125   : > { %538 = vrot.lane.b32.xlu2 %v2605_v58, %s2212_s22  ;;  %506 = vrot.lane.b32.xlu1 %v2511_v36, %s2212_s22 }
 0x127   : > { %474 = vrot.lane.b32.xlu0 %v2423_v44, %s2212_s22  ;;  %v485_v37 = vpop.permute.xlu2 %484  ;;  %v2809_v2 = vpop.permute.xlu1 %446  ;;  %v2824_v44 = vadd.f32 %v551_v1, %v2365_v15  ;;  %v2841_v1 = vadd.f32 %v647_v29, %v2365_v15 }
 0x128   : > { %5100 = vst [vmem:[#allocation74_spill] sm:$0xff] %v2809_v2  ;;  %v563_v36 = vadd.f32 %v485_v37, %v2653_v57  ;;  %v4955_v37 = vmov 0.0  }
 0x129   : > { %v2811_v20 = vpop.permute.xlu0 %444  ;;  %5102 = vst [vmem:[#allocation76_spill] sm:$0xff] %v2824_v44  ;;  %v2848_v57 = vsel %vm1546_vm2, 1.0, %v4955_v37  ;;  %v2859_v37 = vmul.f32 9.0, %v2349_v7 }
 0x12a   : > { %5101 = vst [vmem:[#allocation75_spill] sm:$0xff] %v2811_v20  ;;  %v2855_v20 = vadd.f32 %v563_v36, %v2437_v51 }
 0x12b   : > { %5103 = vst [vmem:[#allocation77_spill] sm:$0xff] %v2841_v1 }
 0x12d   : > { %540 = vrot.lane.b32.xlu2 %v2633_v46, %s2212_s22  ;;  %508 = vrot.lane.b32.xlu1 %v2509_v32, %s2212_s22  ;;  %v659_v32 = vmul.f32 0.5, %v563_v36 }
 0x12f   : > { %476 = vrot.lane.b32.xlu0 %v2421_v43, %s2212_s22  ;;  %v515_v29 = vpop.permute.xlu2 %514  ;;  %v453_v43 = vpop.permute.xlu1 %452 }
 0x130   : > { %v578_v58 = vadd.f32 %v515_v29, %v2713_v23  ;;  %v547_v2 = vadd.f32 %v453_v43, %v2645_v56 }
 0x131   : > { %v451_v15 = vpop.permute.xlu0 %450 }
 0x132   : > { %v546_v46 = vadd.f32 %v451_v15, %v2627_v31  ;;  %v2872_v23 = vadd.f32 %v578_v58, %v2527_v47  ;;  %v674_v29 = vmul.f32 0.5, %v578_v58  ;;  %v595_v7 = vadd.f32 %v547_v2, %v2369_v17 }
 0x133   : > { %v643_v24 = vmul.f32 0.5, %v547_v2  ;;  %v2879_v31 = vadd.f32 %v659_v32, %v2437_v51 }
 0x134   : > { %v2876_v43 = vadd.f32 %v546_v46, %v2351_v8  ;;  %v642_v15 = vmul.f32 0.5, %v546_v46  ;;  %v2884_v36 = vadd.f32 %v674_v29, %v2527_v47  ;;  %v741_v58 = vrot.slane %v595_v7, 7 }
 0x135   : > { %v691_v11 = vadd.f32 %v643_v24, %v2369_v17  ;;  %v888_v40 = vrot.slane %v595_v7, 1  ;;  %542 = vrot.lane.b32.xlu2 %v2631_v45, %s2212_s22  ;;  %510 = vrot.lane.b32.xlu1 %v2531_v49, %s2212_s22  ;;  %v5105_v17 = vrot.slane %v2818_v35, 7  ;;  %v5106_v29 = vrot.slane %v2818_v35, 1 }
 0x136   : > { %5104 = vst [vmem:[#allocation78_spill] sm:$0xff] %v2884_v36  ;;  %v2888_v2 = vadd.f32 %v642_v15, %v2351_v8  ;;  %v5107_v49 = vrot.slane %v2876_v43, 7  ;;  %v5108_v45 = vrot.slane %v2876_v43, 1  ;;  %v4978_v25 = vrot.slane %v2884_v36, 7 }
 0x137   : > { %478 = vrot.lane.b32.xlu0 %v2419_v42, %s2212_s22  ;;  %v828_v24 = vsel %vm788_vm3, %v741_v58, %v5105_v17  ;;  %v973_v15 = vsel %vm933_vm4, %v888_v40, %v5106_v29  ;;  %v1033_v46 = vrot.slane %v691_v11, 7  ;;  %v1129_v32 = vrot.slane %v691_v11, 1  ;;  %v545_v56 = vpop.permute.xlu2 %544  ;;  %v459_v29 = vpop.permute.xlu1 %458 }
 0x138   : > { %v2909_v13 = vadd.f32 %v828_v24, %v2818_v35  ;;  %v831_v42 = vsel %vm788_vm3, %v5107_v49, %v741_v58  ;;  %v2919_v17 = vsel %vm933_vm4, %v5108_v45, %v888_v40  ;;  %v4974_v21 = vrot.slane %v2888_v2, 7 }
 0x139   : > { %v457_v59 = vpop.permute.xlu0 %456  ;;  %v2926_v24 = vsel %vm788_vm3, %v1033_v46, %v5109_v50  ;;  %v1213_v49 = vsel %vm933_vm4, %v1129_v32, %v5110_v41  ;;  %v838_v58 = vadd.f32 %v831_v42, %v595_v7  ;;  %v4972_v6 = vrot.slane %v2888_v2, 1 }
 0x13a   : > { %v1120_v40 = vsel %vm788_vm3, %v4974_v21, %v1033_v46  ;;  %v593_v45 = vadd.f32 %v545_v56, %v2773_v26  ;;  %v550_v0 = vadd.f32 %v459_v29, %v2560_v5  ;;  %v549_v50 = vadd.f32 %v457_v59, %v2643_v55 }
 0x13b   : > { %v983_v47 = vadd.f32 %v973_v15, %v838_v58  ;;  %v2945_v42 = vsel %vm933_vm4, %v4972_v6, %v1129_v32  ;;  %v1223_v41 = vadd.f32 %v1213_v49, %v1120_v40  ;;  %v4984_v5 = vrot.slane %v2884_v36, 1 }
 0x13c   : > { %v2948_v7 = vadd.f32 %v593_v45, %v2629_v38  ;;  %v689_v46 = vmul.f32 0.5, %v593_v45  ;;  %v598_v26 = vadd.f32 %v550_v0, %v2344_v3  ;;  %v646_v56 = vmul.f32 0.5, %v550_v0 }
 0x13d   : > { %v1271_v59 = vmul.f32 0.5, %v1223_v41  ;;  %v1415_v55 = vsub.f32 %v2836_v33, %v983_v47  ;;  %v597_v15 = vadd.f32 %v549_v50, %v2367_v16  ;;  %v645_v58 = vmul.f32 0.5, %v549_v50 }
 0x13e   : > { %5111 = vst [vmem:[#allocation79_spill] sm:$0xff] %v2948_v7  ;;  %v2955_v29 = vadd.f32 %v689_v46, %v2629_v38  ;;  %v4973_v32 = vrot.slane %v2948_v7, 7  ;;  %v4975_v49 = vrot.slane %v2948_v7, 1  ;;  %v694_v45 = vadd.f32 %v646_v56, %v2344_v3 }
 0x13f   : > { %v2959_v40 = vadd.f32 %v1271_v59, %v691_v11  ;;  %v750_v0 = vrot.slane %v598_v26, 7  ;;  %v897_v6 = vrot.slane %v598_v26, 1  ;;  %v5113_v41 = vrot.slane %v2872_v23, 7  ;;  %v491_v21 = vpop.permute.xlu2 %490 }
 0x140   : > { %5112 = vst [vmem:[#allocation80_spill] sm:$0xff] %v2955_v29  ;;  %v5114_v33 = vrot.slane %v2872_v23, 1  ;;  %v4977_v11 = vrot.slane %v2955_v29, 7  ;;  %v4983_v3 = vrot.slane %v2955_v29, 1  ;;  %v1594_v46 = vand.u32 2147483647, %v1415_v55 }
 0x141   : > { %v836_v47 = vsel %vm788_vm3, %v4973_v32, %v5113_v41  ;;  %v5116_v41 = vrot.slane %v2824_v44, 7  ;;  %v1042_v38 = vrot.slane %v694_v45, 7  ;;  %v747_v29 = vrot.slane %v597_v15, 7 }
 0x142   : > { %v2974_v50 = vsel %vm933_vm4, %v4975_v49, %v5114_v33  ;;  %v2981_v59 = vadd.f32 %v836_v47, %v2872_v23  ;;  %v2993_v33 = vsel %vm788_vm3, %v4977_v11, %v4978_v25  ;;  %v3001_v47 = vsel %vm933_vm4, %v4983_v3, %v4984_v5 }
 0x143   : > { %5115 = vst [vmem:[#allocation81_spill] sm:$0xff] %v2974_v50  ;;  %v819_v32 = vsel %vm788_vm3, %v750_v0, %v5116_v41  ;;  %v5120_v41 = vrot.slane %v2824_v44, 1  ;;  %v1138_v11 = vrot.slane %v694_v45, 1  ;;  %v693_v25 = vadd.f32 %v645_v58, %v2367_v16  ;;  %v483_v16 = vpop.permute.xlu1 %482 }
 0x144   : > { %5117 = vst [vmem:[#allocation82_spill] sm:$0xff] %v2993_v33  ;;  %v3004_v49 = vadd.f32 %v819_v32, %v2824_v44  ;;  %v1765_v50 = vand.u32 2147483647, %v2959_v40  ;;  %v894_v7 = vrot.slane %v597_v15, 1  ;;  %v566_v3 = vadd.f32 %v491_v21, %v2665_v12 }
 0x145   : > { %5118 = vst [vmem:[#allocation83_spill] sm:$0xff] %v3001_v47  ;;  %v964_v56 = vsel %vm933_vm4, %v897_v6, %v5120_v41  ;;  %v5121_v5 = vrot.slane %v2841_v1, 7  ;;  %v5123_v47 = vrot.slane %v2841_v1, 1  ;;  %v1039_v41 = vrot.slane %v693_v25, 7 }
 0x146   : > { %5119 = vst [vmem:[#allocation84_spill] sm:$0xff] %v3004_v49  ;;  %v1135_v49 = vrot.slane %v693_v25, 1  ;;  %v822_v58 = vsel %vm788_vm3, %v747_v29, %v750_v0  ;;  %v5124_v40 = vrot.slane %v2818_v35, 7  ;;  %v967_v12 = vsel %vm933_vm4, %v894_v7, %v897_v6 }
 0x147   : > { %v3017_v32 = vsel %vm788_vm3, %v1042_v38, %v5121_v5  ;;  %v1204_v55 = vsel %vm933_vm4, %v1138_v11, %v5123_v47  ;;  %v5125_v5 = vrot.slane %v2818_v35, 1  ;;  %v841_v1 = vadd.f32 %v822_v58, %v598_v26 }
 0x148   : > { %5122 = vst [vmem:[#allocation85_spill] sm:$0xff] %v3017_v32  ;;  %v825_v21 = vsel %vm788_vm3, %v5124_v40, %v747_v29  ;;  %v1111_v0 = vsel %vm788_vm3, %v1039_v41, %v1042_v38  ;;  %v5126_v33 = vrot.slane %v2821_v30, 7  ;;  %v1207_v6 = vsel %vm933_vm4, %v1135_v49, %v1138_v11 }
 0x149   : > { %v970_v32 = vsel %vm933_vm4, %v5125_v5, %v894_v7  ;;  %v840_v47 = vadd.f32 %v825_v21, %v597_v15  ;;  %v5127_v35 = vrot.slane %v2821_v30, 1  ;;  %v1226_v15 = vadd.f32 %v1204_v55, %v1111_v0 }
 0x14a   : > { %v984_v44 = vadd.f32 %v970_v32, %v2909_v13  ;;  %v1114_v29 = vsel %vm788_vm3, %v5126_v33, %v1039_v41  ;;  %v986_v58 = vadd.f32 %v964_v56, %v841_v1  ;;  %v3051_v21 = vadd.f32 %v566_v3, %v2455_v60 }
 0x14b   : > { %v1210_v7 = vsel %vm933_vm4, %v5127_v35, %v1135_v49  ;;  %v985_v26 = vadd.f32 %v967_v12, %v840_v47  ;;  %v1225_v32 = vadd.f32 %v1207_v6, %v1114_v29  ;;  %v1274_v38 = vmul.f32 0.5, %v1226_v15 }
 0x14c   : > { %v1224_v13 = vadd.f32 %v1210_v7, %v2926_v24  ;;  %v1416_v40 = vsub.f32 %v2859_v37, %v984_v44  ;;  %v662_v33 = vmul.f32 0.5, %v566_v3  ;;  %v1418_v36 = vsub.f32 %v2867_v9, %v986_v58  ;;  %v481_v9 = vpop.permute.xlu0 %480 }
 0x14d   : > { %v1273_v11 = vmul.f32 0.5, %v1225_v32  ;;  %v1417_v5 = vsub.f32 %v2864_v34, %v985_v26  ;;  %v1322_v49 = vadd.f32 %v1274_v38, %v694_v45  ;;  %v562_v24 = vadd.f32 %v483_v16, %v2691_v27  ;;  %v525_v45 = vpop.permute.xlu2 %524 }
 0x14e   : > { %v1272_v41 = vmul.f32 0.5, %v1224_v13  ;;  %v1595_v55 = vand.u32 2147483647, %v1416_v40  ;;  %v3056_v1 = vadd.f32 %v662_v33, %v2455_v60  ;;  %v1597_v12 = vand.u32 2147483647, %v1418_v36  ;;  %v513_v36 = vpop.permute.xlu1 %512 }
 0x14f   : > { %v1321_v44 = vadd.f32 %v1273_v11, %v693_v25  ;;  %v1596_v37 = vand.u32 2147483647, %v1417_v5  ;;  %v3061_v3 = vmul.f32 %v2848_v57, %v1594_v46  ;;  %v3064_v47 = vmul.f32 %v2848_v57, %v1765_v50 }
 0x150   : > { %v1320_v56 = vadd.f32 %v1272_v41, %v2821_v30  ;;  %v1768_v34 = vand.u32 2147483647, %v1322_v49  ;;  %v3068_v0 = vmul.f32 %v2848_v57, %v1595_v55  ;;  %v3077_v16 = vadd.f32 %v562_v24, %v2439_v52 }
 0x151   : > { %v3073_v46 = vmul.f32 %v2848_v57, %v1596_v37  ;;  %v658_v29 = vmul.f32 0.5, %v562_v24  ;;  %v3080_v6 = vmul.f32 %v2848_v57, %v1597_v12  ;;  %v1767_v35 = vand.u32 2147483647, %v1321_v44 }
 0x152   : > { %v1766_v27 = vand.u32 2147483647, %v1320_v56  ;;  %v3083_v7 = vmul.f32 %v2848_v57, %v1768_v34  ;;  %v561_v15 = vadd.f32 %v481_v9, %v2693_v54  ;;  %v739_v13 = vrot.slane %v3077_v16, 7 }
 0x153   : > { %5128 = vst [vmem:[#allocation86_spill] sm:$0xff] %v3080_v6  ;;  %v3088_v58 = vadd.f32 %v658_v29, %v2439_v52  ;;  %v886_v32 = vrot.slane %v3077_v16, 1  ;;  %v583_v33 = vadd.f32 %v525_v45, %v2775_v22  ;;  %v5130_v41 = vrot.slane %v2855_v20, 7 }
 0x154   : > { %v3097_v38 = vmul.f32 %v2848_v57, %v1766_v27  ;;  %v3100_v40 = vadd.f32 %v561_v15, %v2441_v53  ;;  %v657_v54 = vmul.f32 0.5, %v561_v15  ;;  %v5131_v5 = vrot.slane %v2855_v20, 1  ;;  %v487_v26 = vpop.permute.xlu0 %486 }
 0x155   : > { %v832_v11 = vsel %vm788_vm3, %v739_v13, %v5130_v41  ;;  %v1031_v55 = vrot.slane %v3088_v58, 7  ;;  %v1127_v24 = vrot.slane %v3088_v58, 1  ;;  %v5133_v12 = vrot.slane %v2879_v31, 7  ;;  %v527_v25 = vpop.permute.xlu2 %526 }
 0x156   : > { %5129 = vst [vmem:[#allocation87_spill] sm:$0xff] %v3100_v40  ;;  %v977_v49 = vsel %vm933_vm4, %v886_v32, %v5131_v5  ;;  %v3114_v56 = vadd.f32 %v832_v11, %v2855_v20  ;;  %v3119_v22 = vadd.f32 %v657_v54, %v2441_v53  ;;  %v4991_v44 = vrot.slane %v3100_v40, 7 }
 0x157   : > { %v4992_v37 = vrot.slane %v3100_v40, 1  ;;  %v3127_v34 = vsel %vm788_vm3, %v1031_v55, %v5133_v12  ;;  %v5134_v9 = vrot.slane %v2879_v31, 1  ;;  %v3134_v27 = vadd.f32 %v583_v33, %v2567_v18 }
 0x158   : > { %5132 = vst [vmem:[#allocation88_spill] sm:$0xff] %v3119_v22  ;;  %v679_v29 = vmul.f32 0.5, %v583_v33  ;;  %v5135_v15 = vrot.slane %v2876_v43, 7  ;;  %v5136_v41 = vrot.slane %v2876_v43, 1  ;;  %v4995_v5 = vrot.slane %v3119_v22, 7 }
 0x159   : > { %v1217_v45 = vsel %vm933_vm4, %v1127_v24, %v5134_v9  ;;  %v4998_v12 = vrot.slane %v3119_v22, 1  ;;  %v3153_v33 = vmul.f32 %v2848_v57, %v1767_v35  ;;  %v5138_v9 = vmov 0.0  }
 0x15a   : > { %v834_v54 = vsel %vm788_vm3, %v4991_v44, %v5135_v15  ;;  %v3148_v11 = vsel %vm933_vm4, %v4992_v37, %v5136_v41  ;;  %v3156_v50 = vsel %vm1545_vm7, 1.0, %v5138_v9  ;;  %v1366_v44 = vmul.f32 9.0, %v2351_v8 }
 0x15b   : > { %5137 = vst [vmem:[#allocation89_spill] sm:$0xff] %v3148_v11  ;;  %v837_v15 = vadd.f32 %v834_v54, %v2876_v43  ;;  %v5139_v30 = vrot.slane %v2888_v2, 7  ;;  %v5140_v37 = vrot.slane %v2888_v2, 1  ;;  %v1382_v43 = vmul.f32 9.0, %v2439_v52  ;;  %v519_v54 = vpop.permute.xlu1 %518 }
 0x15c   : > { %v577_v8 = vadd.f32 %v513_v36, %v2751_v61  ;;  %v3179_v11 = vadd.f32 %v679_v29, %v2567_v18  ;;  %v584_v52 = vadd.f32 %v527_v25, %v2737_v28  ;;  %v1383_v36 = vmul.f32 9.0, %v2437_v51 }
 0x15d   : > { %v1123_v41 = vsel %vm788_vm3, %v4995_v5, %v5139_v30  ;;  %v3172_v35 = vsel %vm933_vm4, %v4998_v12, %v5140_v37  ;;  %v982_v9 = vadd.f32 %v2919_v17, %v837_v15  ;;  %v5003_v30 = vrot.slane %v3134_v27, 7 }
 0x15e   : > { %5141 = vst [vmem:[#allocation90_spill] sm:$0xff] %v3172_v35  ;;  %v1222_v39 = vadd.f32 %v2945_v42, %v1123_v41  ;;  %v3183_v5 = vadd.f32 %v577_v8, %v2529_v48  ;;  %v673_v22 = vmul.f32 0.5, %v577_v8  ;;  %v564_v37 = vadd.f32 %v487_v26, %v2705_v4 }
 0x15f   : > { %v1414_v61 = vsub.f32 %v1366_v44, %v982_v9  ;;  %v580_v17 = vadd.f32 %v519_v54, %v2763_v19  ;;  %v3340_v35 = vmul.f32 9.0, %v2547_v63 }
 0x160   : > { %5142 = vst [vmem:[#allocation91_spill] sm:$0xff] %v3183_v5  ;;  %v1270_v12 = vmul.f32 0.5, %v1222_v39  ;;  %v3190_v42 = vadd.f32 %v673_v22, %v2529_v48  ;;  %v5002_v29 = vrot.slane %v3183_v5, 7  ;;  %v5001_v15 = vrot.slane %v3183_v5, 1 }
 0x161   : > { %v3195_v41 = vadd.f32 %v564_v37, %v2459_v62  ;;  %v1593_v26 = vand.u32 2147483647, %v1414_v61  ;;  %v660_v28 = vmul.f32 0.5, %v564_v37  ;;  %v3199_v39 = vadd.f32 %v584_v52, %v2565_v14 }
 0x162   : > { %5143 = vst [vmem:[#allocation92_spill] sm:$0xff] %v3190_v42  ;;  %v1318_v4 = vadd.f32 %v1270_v12, %v2888_v2  ;;  %v835_v51 = vsel %vm788_vm3, %v5002_v29, %v739_v13  ;;  %v3209_v19 = vsel %vm933_vm4, %v5001_v15, %v886_v32  ;;  %v5000_v25 = vrot.slane %v3190_v42, 7 }
 0x163   : > { %5144 = vst [vmem:[#allocation93_spill] sm:$0xff] %v3209_v19  ;;  %v4999_v2 = vrot.slane %v3190_v42, 1  ;;  %v1641_v22 = vmul.f32 %v3156_v50, %v1593_v26  ;;  %v853_v12 = vadd.f32 %v835_v51, %v3077_v16  ;;  %v3216_v9 = vadd.f32 %v660_v28, %v2459_v62 }
 0x164   : > { %v1764_v44 = vand.u32 2147483647, %v1318_v4  ;;  %v1124_v13 = vsel %vm788_vm3, %v5000_v25, %v1031_v55  ;;  %v5008_v8 = vrot.slane %v3195_v41, 7  ;;  %v5007_v54 = vrot.slane %v3195_v41, 1 }
 0x165   : > { %v3226_v32 = vsel %vm933_vm4, %v4999_v2, %v1127_v24  ;;  %v1689_v16 = vadd.f32 %v3061_v3, %v1641_v22  ;;  %v998_v61 = vadd.f32 %v977_v49, %v853_v12  ;;  %v1238_v4 = vadd.f32 %v1217_v45, %v1124_v13 }
 0x166   : > { %5145 = vst [vmem:[#allocation94_spill] sm:$0xff] %v3226_v32  ;;  %v1812_v37 = vmul.f32 %v3156_v50, %v1764_v44  ;;  %v5146_v55 = vrot.slane %v2855_v20, 7  ;;  %v5147_v24 = vrot.slane %v2855_v20, 1  ;;  %v5006_v3 = vrot.slane %v3216_v9, 7 }
 0x167   : > { %v5005_v51 = vrot.slane %v3216_v9, 1  ;;  %v3247_v49 = vadd.f32 %v1689_v16, %v3068_v0  ;;  %v1286_v22 = vmul.f32 0.5, %v1238_v4  ;;  %v1430_v44 = vsub.f32 %v1382_v43, %v998_v61 }
 0x168   : > { %v829_v26 = vsel %vm788_vm3, %v5146_v55, %v5008_v8  ;;  %v974_v28 = vsel %vm933_vm4, %v5147_v24, %v5007_v54  ;;  %v1860_v45 = vadd.f32 %v3064_v47, %v1812_v37  ;;  %v5148_v20 = vrot.slane %v2879_v31, 7  ;;  %v5153_v8 = vld [vmem:[#allocation70_spill] sm:$0xff] }
 0x169   : > { %v3251_v12 = vadd.f32 %v829_v26, %v3195_v41  ;;  %v999_v13 = vadd.f32 %v974_v28, %v3114_v56  ;;  %v5149_v0 = vrot.slane %v2879_v31, 1  ;;  %v3272_v56 = vadd.f32 %v1286_v22, %v3088_v58 }
 0x16a   : > { %v3260_v55 = vsel %vm788_vm3, %v5148_v20, %v5006_v3  ;;  %v3269_v43 = vadd.f32 %v1860_v45, %v3097_v38  ;;  %v1609_v16 = vand.u32 2147483647, %v1430_v44  ;;  %v5004_v61 = vrot.slane %v3134_v27, 1 }
 0x16b   : > { %v1214_v47 = vsel %vm933_vm4, %v5149_v0, %v5005_v51  ;;  %v1431_v4 = vsub.f32 %v1383_v36, %v999_v13  ;;  %v680_v26 = vmul.f32 0.5, %v584_v52  ;;  %v5011_v24 = vrot.slane %v3199_v39, 7  ;;  %v517_v36 = vpop.permute.xlu0 %516 }
 0x16c   : > { %v1239_v37 = vadd.f32 %v1214_v47, %v3127_v34  ;;  %v5009_v28 = vrot.slane %v3179_v11, 7  ;;  %v1657_v20 = vmul.f32 %v3156_v50, %v1609_v16  ;;  %v905_v38 = vrot.slane %v3199_v39, 1  ;;  %v5150_v47 = vld [vmem:[#allocation29_spill] sm:$0xff] }
 0x16d   : > { %v1610_v45 = vand.u32 2147483647, %v1431_v4  ;;  %v3281_v58 = vadd.f32 %v680_v26, %v2565_v14  ;;  %v818_v34 = vsel %vm788_vm3, %v5003_v30, %v5011_v24  ;;  %v3290_v52 = vadd.f32 %v580_v17, %v2547_v63 }
 0x16e   : > { %v1287_v0 = vmul.f32 0.5, %v1239_v37  ;;  %v5012_v22 = vrot.slane %v3179_v11, 1  ;;  %v676_v13 = vmul.f32 0.5, %v580_v17  ;;  %v1398_v16 = vmul.f32 9.0, %v5150_v47  ;;  %v5151_v17 = vld [vmem:[#allocation67_spill] sm:$0xff]  ;;  %v529_v47 = vpop.permute.xlu2 %528 }
 0x16f   : > { %v1658_v4 = vmul.f32 %v2848_v57, %v1610_v45  ;;  %v5010_v26 = vrot.slane %v3281_v58, 7  ;;  %v1146_v2 = vrot.slane %v3281_v58, 1  ;;  %v875_v25 = vadd.f32 %v818_v34, %v3199_v39 }
 0x170   : > { %v3294_v44 = vadd.f32 %v1287_v0, %v2879_v31  ;;  %v3306_v15 = vsel %vm933_vm4, %v5004_v61, %v905_v38  ;;  %v3309_v31 = vadd.f32 %v676_v13, %v2547_v63  ;;  %v579_v0 = vadd.f32 %v517_v36, %v5151_v17  ;;  %v5152_v13 = vld [vmem:[#allocation33_spill] sm:$0xff] }
 0x171   : > { %v3312_v29 = vadd.f32 %v1658_v4, %v1657_v20  ;;  %v1107_v61 = vsel %vm788_vm3, %v5009_v28, %v5010_v26  ;;  %v1399_v51 = vmul.f32 9.0, %v5152_v13  ;;  %v521_v20 = vpop.permute.xlu1 %520  ;;  %v3329_v4 = vsel %vm933_vm4, %v5012_v22, %v1146_v2  ;;  %v5155_v22 = vld [vmem:[#allocation59_spill] sm:$0xff] }
 0x172   : > { %v627_v36 = vadd.f32 %v579_v0, %v5152_v13  ;;  %v675_v17 = vmul.f32 0.5, %v579_v0  ;;  %v1404_v54 = vmul.f32 9.0, %v2565_v14  ;;  %v585_v45 = vadd.f32 %v529_v47, %v5153_v8  ;;  %v5154_v0 = vld [vmem:[#allocation37_spill] sm:$0xff] }
 0x173   : > { %v581_v40 = vadd.f32 %v521_v20, %v5155_v22  ;;  %v5156_v3 = vrot.slane %v3290_v52, 7  ;;  %v5157_v8 = vrot.slane %v2872_v23, 7  ;;  %v5159_v63 = vrot.slane %v2872_v23, 1 }
 0x174   : > { %v723_v37 = vadd.f32 %v675_v17, %v5152_v13  ;;  %v743_v26 = vrot.slane %v627_v36, 7  ;;  %v890_v24 = vrot.slane %v627_v36, 1  ;;  %v3337_v34 = vadd.f32 %v585_v45, %v5154_v0 }
 0x175   : > { %v681_v30 = vmul.f32 0.5, %v585_v45  ;;  %v5158_v13 = vrot.slane %v3290_v52, 1  ;;  %v5160_v23 = vrot.slane %v3309_v31, 7 }
 0x176   : > { %v830_v14 = vsel %vm788_vm3, %v743_v26, %v5156_v3  ;;  %v833_v47 = vsel %vm788_vm3, %v5157_v8, %v743_v26  ;;  %v978_v22 = vsel %vm933_vm4, %v5159_v63, %v890_v24  ;;  %v1035_v28 = vrot.slane %v723_v37, 7  ;;  %v5165_v26 = vld [vmem:[#allocation82_spill] sm:$0xff] }
 0x177   : > { %v975_v45 = vsel %vm933_vm4, %v890_v24, %v5158_v13  ;;  %v870_v17 = vadd.f32 %v833_v47, %v627_v36  ;;  %v871_v20 = vadd.f32 %v830_v14, %v3290_v52  ;;  %v1014_v3 = vadd.f32 %v978_v22, %v2981_v59  ;;  %v5161_v36 = vld [vmem:[#allocation78_spill] sm:$0xff] }
 0x178   : > { %v1131_v32 = vrot.slane %v723_v37, 1  ;;  %v3362_v42 = vadd.f32 %v681_v30, %v5154_v0  ;;  %v5021_v8 = vrot.slane %v3337_v34, 1  ;;  %v1119_v24 = vsel %vm788_vm3, %v1035_v28, %v5160_v23 }
 0x179   : > { %v1015_v13 = vadd.f32 %v975_v45, %v870_v17  ;;  %v5162_v47 = vrot.slane %v5161_v36, 7  ;;  %v1446_v14 = vsub.f32 %v1398_v16, %v1014_v3  ;;  %v5163_v63 = vrot.slane %v3309_v31, 1 }
 0x17a   : > { %v5164_v22 = vrot.slane %v5161_v36, 1  ;;  %v960_v17 = vsel %vm933_vm4, %v905_v38, %v5021_v8  ;;  %v677_v23 = vmul.f32 0.5, %v581_v40 }
 0x17b   : > { %v1122_v59 = vsel %vm788_vm3, %v5162_v47, %v1035_v28  ;;  %v1215_v30 = vsel %vm933_vm4, %v1131_v32, %v5163_v63  ;;  %v1447_v16 = vsub.f32 %v1399_v51, %v1015_v13  ;;  %v1625_v3 = vand.u32 2147483647, %v1446_v14 }
 0x17c   : > { %v1218_v45 = vsel %vm933_vm4, %v5164_v22, %v1131_v32  ;;  %v1255_v28 = vadd.f32 %v1215_v30, %v1122_v59  ;;  %v5166_v47 = vrot.slane %v3337_v34, 7  ;;  %v5167_v63 = vrot.slane %v3199_v39, 7  ;;  %v5168_v22 = vld [vmem:[#allocation32_spill] sm:$0xff] }
 0x17d   : > { %v1254_v19 = vadd.f32 %v1218_v45, %v5165_v26  ;;  %v1020_v53 = vadd.f32 %v960_v17, %v875_v25  ;;  %v1149_v32 = vrot.slane %v3362_v42, 1  ;;  %v3395_v48 = vadd.f32 %v581_v40, %v5168_v22 }
 0x17e   : > { %v815_v5 = vsel %vm788_vm3, %v5167_v63, %v5166_v47  ;;  %v1303_v8 = vmul.f32 0.5, %v1255_v28  ;;  %v1626_v6 = vand.u32 2147483647, %v1447_v16  ;;  %v1053_v26 = vrot.slane %v3362_v42, 7 }
 0x17f   : > { %v1302_v38 = vmul.f32 0.5, %v1254_v19  ;;  %v1673_v51 = vmul.f32 %v3156_v50, %v1625_v3  ;;  %v1200_v39 = vsel %vm933_vm4, %v1146_v2, %v1149_v32  ;;  %v1452_v13 = vsub.f32 %v1404_v54, %v1020_v53 }
 0x180   : > { %v3404_v25 = vadd.f32 %v677_v23, %v5168_v22  ;;  %v1351_v40 = vadd.f32 %v1303_v8, %v723_v37  ;;  %v1674_v19 = vmul.f32 %v2848_v57, %v1626_v6  ;;  %v1260_v14 = vadd.f32 %v1200_v39, %v1107_v61  ;;  %v5171_v8 = vld [vmem:[#allocation19_spill] sm:$0xff] }
 0x181   : > { %v1350_v59 = vadd.f32 %v1302_v38, %v5161_v36  ;;  %v1631_v30 = vand.u32 2147483647, %v1452_v13  ;;  %v749_v45 = vrot.slane %v3395_v48, 7  ;;  %v5024_v17 = vrot.slane %v3395_v48, 1 }
 0x182   : > { %v3411_v28 = vmul.f32 9.0, %v2459_v62  ;;  %v1731_v16 = vadd.f32 %v1674_v19, %v1673_v51  ;;  %v1797_v53 = vand.u32 2147483647, %v1351_v40  ;;  %v1308_v54 = vmul.f32 0.5, %v1260_v14  ;;  %v531_v51 = vpop.permute.xlu2 %530 }
 0x183   : > { %v1796_v2 = vand.u32 2147483647, %v1350_v59  ;;  %v3414_v23 = vadd.f32 %v815_v5, %v3337_v34  ;;  %v5169_v6 = vrot.slane %v3281_v58, 7  ;;  %v5170_v62 = vrot.slane %v3290_v52, 1  ;;  %v489_v5 = vpop.permute.xlu0 %488 }
 0x184   : > { %v3431_v36 = vmul.f32 9.0, %v5171_v8  ;;  %v1845_v47 = vmul.f32 %v2848_v57, %v1797_v53  ;;  %v3436_v63 = vmul.f32 %v2848_v57, %v1631_v30  ;;  %v5023_v38 = vrot.slane %v3404_v25, 7 }
 0x185   : > { %v3422_v61 = vsel %vm788_vm3, %v5169_v6, %v1053_v26  ;;  %v972_v37 = vsel %vm933_vm4, %v5170_v62, %v5024_v17  ;;  %v1844_v3 = vmul.f32 %v3156_v50, %v1796_v2  ;;  %v5022_v13 = vrot.slane %v3404_v25, 1  ;;  %v5175_v6 = vld [vmem:[#allocation56_spill] sm:$0xff] }
 0x186   : > { %v1016_v39 = vadd.f32 %v972_v37, %v871_v20  ;;  %v5172_v59 = vand.u32 2147483647, %v3272_v56  ;;  %v5173_v19 = vand.u32 2147483647, %v3294_v44  ;;  %v3449_v53 = vadd.f32 %v1308_v54, %v3281_v58  ;;  %v5177_v54 = vld [vmem:[#allocation69_spill] sm:$0xff] }
 0x187   : > { %v3446_v2 = vadd.f32 %v1845_v47, %v1844_v3  ;;  %v5174_v30 = vrot.slane %v3290_v52, 7  ;;  %v565_v56 = vadd.f32 %v489_v5, %v5175_v6  ;;  %v586_v37 = vadd.f32 %v531_v51, %v5177_v54 }
 0x188   : > { %v1828_v40 = vmul.f32 %v3156_v50, %v5172_v59  ;;  %v1829_v14 = vmul.f32 %v2848_v57, %v5173_v19  ;;  %v5176_v50 = vrot.slane %v3309_v31, 1  ;;  %v1448_v62 = vsub.f32 %v3340_v35, %v1016_v39  ;;  %v5179_v39 = vld [vmem:[#allocation36_spill] sm:$0xff] }
 0x189   : > { %v827_v20 = vsel %vm788_vm3, %v5174_v30, %v749_v45  ;;  %v5178_v52 = vrot.slane %v3309_v31, 7  ;;  %v613_v47 = vadd.f32 %v565_v56, %v5171_v8  ;;  %v661_v59 = vmul.f32 0.5, %v565_v56 }
 0x18a   : > { %v1212_v44 = vsel %vm933_vm4, %v5176_v50, %v5022_v13  ;;  %v3465_v58 = vadd.f32 %v1829_v14, %v1828_v40  ;;  %v3478_v19 = vadd.f32 %v827_v20, %v3395_v48  ;;  %v1627_v35 = vand.u32 2147483647, %v1448_v62 }
 0x18b   : > { %v3474_v5 = vsel %vm788_vm3, %v5178_v52, %v5023_v38  ;;  %v1256_v3 = vadd.f32 %v1212_v44, %v1119_v24  ;;  %v3481_v40 = vadd.f32 %v586_v37, %v5179_v39  ;;  %v682_v51 = vmul.f32 0.5, %v586_v37 }
 0x18c   : > { %v709_v30 = vadd.f32 %v661_v59, %v5171_v8  ;;  %v748_v6 = vrot.slane %v613_v47, 7  ;;  %v895_v50 = vrot.slane %v613_v47, 1  ;;  %v1802_v54 = vand.u32 2147483647, %v3449_v53 }
 0x18d   : > { %v1304_v14 = vmul.f32 0.5, %v1256_v3  ;;  %v1675_v24 = vmul.f32 %v2848_v57, %v1627_v35  ;;  %v1405_v44 = vmul.f32 9.0, %v5154_v0  ;;  %v5025_v56 = vrot.slane %v3481_v40, 1  ;;  %v493_v3 = vpop.permute.xlu1 %492 }
 0x18e   : > { %v5180_v62 = vrot.slane %v3195_v41, 7  ;;  %v3496_v8 = vadd.f32 %v682_v51, %v5179_v39  ;;  %v764_v52 = vrot.slane %v3481_v40, 7  ;;  %v5181_v0 = vrot.slane %v3051_v21, 7 }
 0x18f   : > { %v3489_v20 = vadd.f32 %v1304_v14, %v3309_v31  ;;  %v3499_v59 = vadd.f32 %v1731_v16, %v1675_v24  ;;  %v5182_v14 = vrot.slane %v3195_v41, 1  ;;  %v1040_v16 = vrot.slane %v709_v30, 7 }
 0x190   : > { %v826_v37 = vsel %vm788_vm3, %v5180_v62, %v748_v6  ;;  %v823_v35 = vsel %vm788_vm3, %v748_v6, %v5181_v0  ;;  %v5183_v62 = vrot.slane %v3051_v21, 1  ;;  %v1136_v24 = vrot.slane %v709_v30, 1 }
 0x191   : > { %v856_v31 = vadd.f32 %v826_v37, %v613_v47  ;;  %v971_v13 = vsel %vm933_vm4, %v5182_v14, %v895_v50  ;;  %v5184_v6 = vrot.slane %v3337_v34, 1  ;;  %v3521_v47 = vmul.f32 9.0, %v2455_v60  ;;  %v5185_v37 = vld [vmem:[#allocation58_spill] sm:$0xff] }
 0x192   : > { %v968_v51 = vsel %vm933_vm4, %v895_v50, %v5183_v62  ;;  %v1000_v38 = vadd.f32 %v971_v13, %v3251_v12  ;;  %v567_v0 = vadd.f32 %v493_v3, %v5185_v37  ;;  %v857_v14 = vadd.f32 %v823_v35, %v3051_v21 }
 0x193   : > { %v1001_v17 = vadd.f32 %v968_v51, %v856_v31  ;;  %v957_v41 = vsel %vm933_vm4, %v5184_v6, %v5025_v56  ;;  %v5186_v50 = vrot.slane %v3216_v9, 7  ;;  %v5187_v13 = vrot.slane %v3056_v1, 1 }
 0x194   : > { %v5188_v62 = vrot.slane %v3216_v9, 1  ;;  %v1432_v35 = vsub.f32 %v3411_v28, %v1000_v38  ;;  %v5189_v37 = vrot.slane %v3337_v34, 7  ;;  %v5027_v56 = vrot.slane %v3496_v8, 7  ;;  %v5190_v28 = vld [vmem:[#allocation22_spill] sm:$0xff] }
 0x195   : > { %v1115_v12 = vsel %vm788_vm3, %v5186_v50, %v1040_v16  ;;  %v1208_v31 = vsel %vm933_vm4, %v1136_v24, %v5187_v13  ;;  %v1433_v6 = vsub.f32 %v3431_v36, %v1001_v17  ;;  %v1021_v13 = vadd.f32 %v957_v41, %v3414_v23 }
 0x196   : > { %v1211_v60 = vsel %vm933_vm4, %v5188_v62, %v1136_v24  ;;  %v1241_v3 = vadd.f32 %v1208_v31, %v1115_v12  ;;  %v812_v50 = vsel %vm788_vm3, %v5189_v37, %v764_v52  ;;  %v1152_v24 = vrot.slane %v3496_v8, 1 }
 0x197   : > { %v1240_v51 = vadd.f32 %v1211_v60, %v3260_v55  ;;  %v1611_v12 = vand.u32 2147483647, %v1432_v35  ;;  %v1612_v31 = vand.u32 2147483647, %v1433_v6  ;;  %v1453_v17 = vsub.f32 %v1405_v44, %v1021_v13 }
 0x198   : > { %v1289_v55 = vmul.f32 0.5, %v1241_v3  ;;  %v1197_v34 = vsel %vm933_vm4, %v1149_v32, %v1152_v24  ;;  %v3556_v36 = vadd.f32 %v567_v0, %v5190_v28  ;;  %v663_v23 = vmul.f32 0.5, %v567_v0 }
 0x199   : > { %v1288_v62 = vmul.f32 0.5, %v1240_v51  ;;  %v1659_v60 = vmul.f32 %v2848_v57, %v1611_v12  ;;  %v1660_v51 = vmul.f32 %v2848_v57, %v1612_v31  ;;  %v1261_v3 = vadd.f32 %v1197_v34, %v3422_v61 }
 0x19a   : > { %v1337_v41 = vadd.f32 %v1289_v55, %v709_v30  ;;  %v1632_v35 = vand.u32 2147483647, %v1453_v17  ;;  %v3563_v6 = vadd.f32 %v663_v23, %v5190_v28  ;;  %v5030_v32 = vrot.slane %v3556_v36, 7 }
 0x19b   : > { %v1336_v38 = vadd.f32 %v1288_v62, %v3216_v9  ;;  %v1711_v44 = vadd.f32 %v3312_v29, %v1659_v60  ;;  %v5029_v0 = vrot.slane %v3556_v36, 1  ;;  %v1798_v9 = vand.u32 2147483647, %v3489_v20 }
 0x19c   : > { %v1783_v13 = vand.u32 2147483647, %v1337_v41  ;;  %v5191_v30 = vrot.slane %v3056_v1, 7  ;;  %v1309_v61 = vmul.f32 0.5, %v1261_v3  ;;  %v5026_v55 = vrot.slane %v3563_v6, 7  ;;  %v523_v3 = vpop.permute.xlu0 %522 }
 0x19d   : > { %v1782_v37 = vand.u32 2147483647, %v1336_v38  ;;  %v1712_v12 = vadd.f32 %v1711_v44, %v1660_v51  ;;  %v3576_v34 = vadd.f32 %v812_v50, %v3481_v40  ;;  %v5192_v29 = vrot.slane %v3051_v21, 7 }
 0x19e   : > { %v1112_v62 = vsel %vm788_vm3, %v1040_v16, %v5191_v30  ;;  %v3590_v16 = vsel %vm788_vm3, %v1053_v26, %v5027_v56  ;;  %v1357_v17 = vadd.f32 %v1309_v61, %v3362_v42  ;;  %v5193_v50 = vrot.slane %v3051_v21, 1 }
 0x19f   : > { %v1830_v31 = vmul.f32 %v2848_v57, %v1782_v37  ;;  %v820_v20 = vsel %vm788_vm3, %v5192_v29, %v5030_v32  ;;  %v5028_v38 = vrot.slane %v3563_v6, 1  ;;  %v1831_v41 = vmul.f32 %v2848_v57, %v1783_v13  ;;  %v533_v37 = vpop.permute.xlu2 %532  ;;  %v495_v29 = vpop.permute.xlu1 %494 }
 0x1a0   : > { %v965_v23 = vsel %vm933_vm4, %v5193_v50, %v5029_v0  ;;  %v3603_v51 = vmul.f32 %v2848_v57, %v1632_v35  ;;  %v3606_v42 = vadd.f32 %v820_v20, %v3556_v36  ;;  %v5194_v21 = vmov %v5191_v30  ;;  %v5196_v50 = vld [vmem:[#allocation34_spill] sm:$0xff] }
 0x1a1   : > { %v1882_v60 = vadd.f32 %v3465_v58, %v1830_v31  ;;  %v1002_v26 = vadd.f32 %v965_v23, %v857_v14  ;;  %v3614_v44 = vsel %vm788_vm3, %v5194_v21, %v5026_v55  ;;  %v5195_v58 = vrot.slane %v3056_v1, 1  ;;  %v5197_v55 = vld [vmem:[#allocation68_spill] sm:$0xff] }
 0x1a2   : > { %v1846_v14 = vmul.f32 %v2848_v57, %v1798_v9  ;;  %v1803_v30 = vand.u32 2147483647, %v1357_v17  ;;  %v1401_v20 = vmul.f32 9.0, %v5168_v22  ;;  %v1402_v23 = vmul.f32 9.0, %v5196_v50  ;;  %v5199_v17 = vld [vmem:[#allocation57_spill] sm:$0xff] }
 0x1a3   : > { %v1205_v35 = vsel %vm933_vm4, %v5195_v58, %v5028_v38  ;;  %v3623_v13 = vadd.f32 %v1882_v60, %v1831_v41  ;;  %v1434_v31 = vsub.f32 %v3521_v47, %v1002_v26  ;;  %v582_v56 = vadd.f32 %v523_v3, %v5197_v55  ;;  %v5198_v41 = vld [vmem:[#allocation64_spill] sm:$0xff] }
 0x1a4   : > { %v1242_v61 = vadd.f32 %v1205_v35, %v1112_v62  ;;  %v3629_v21 = vadd.f32 %v3446_v2, %v1846_v14  ;;  %v1403_v9 = vmul.f32 9.0, %v2567_v18  ;;  %v587_v60 = vadd.f32 %v533_v37, %v5198_v41  ;;  %v5200_v14 = vld [vmem:[#allocation35_spill] sm:$0xff] }
 0x1a5   : > { %v1613_v38 = vand.u32 2147483647, %v1434_v31  ;;  %v3637_v47 = vmul.f32 %v2848_v57, %v1802_v54  ;;  %v630_v22 = vadd.f32 %v582_v56, %v5196_v50  ;;  %v678_v62 = vmul.f32 0.5, %v582_v56 }
 0x1a6   : > { %v1290_v58 = vmul.f32 0.5, %v1242_v61  ;;  %v3641_v26 = vadd.f32 %v495_v29, %v5199_v17  ;;  %v3644_v2 = vmul.f32 %v2848_v57, %v1803_v30  ;;  %v3649_v3 = vmul.f32 9.0, %v5179_v39  ;;  %v5201_v30 = vld [vmem:[#allocation21_spill] sm:$0xff] }
 0x1a7   : > { %v1661_v18 = vmul.f32 %v2848_v57, %v1613_v38  ;;  %v726_v53 = vadd.f32 %v678_v62, %v5196_v50  ;;  %v752_v54 = vrot.slane %v630_v22, 7  ;;  %v899_v35 = vrot.slane %v630_v22, 1 }
 0x1a8   : > { %v1338_v55 = vadd.f32 %v1290_v58, %v3056_v1  ;;  %v3653_v37 = vadd.f32 %v587_v60, %v5200_v14  ;;  %v683_v56 = vmul.f32 0.5, %v587_v60  ;;  %v3656_v61 = vmul.f32 9.0, %v5190_v28  ;;  %v5202_v1 = vld [vmem:[#allocation8_spill] sm:$0xff] }
 0x1a9   : > { %v3660_v31 = vadd.f32 %v3641_v26, %v5201_v30  ;;  %v3663_v38 = vmul.f32 9.0, %v5202_v1  ;;  %v3665_v39 = vadd.f32 %v1712_v12, %v1661_v18  ;;  %v5203_v29 = vrot.slane %v3134_v27, 7 }
 0x1aa   : > { %v824_v28 = vsel %vm788_vm3, %v749_v45, %v752_v54  ;;  %v5204_v58 = vrot.slane %v3395_v48, 1  ;;  %v1784_v60 = vand.u32 2147483647, %v1338_v55  ;;  %v5205_v18 = vrot.slane %v3134_v27, 1 }
 0x1ab   : > { %v821_v50 = vsel %vm788_vm3, %v752_v54, %v5203_v29  ;;  %v873_v62 = vadd.f32 %v824_v28, %v630_v22  ;;  %v1044_v29 = vrot.slane %v726_v53, 7  ;;  %v1140_v0 = vrot.slane %v726_v53, 1 }
 0x1ac   : > { %v969_v41 = vsel %vm933_vm4, %v5204_v58, %v899_v35  ;;  %v874_v12 = vadd.f32 %v821_v50, %v3134_v27  ;;  %v966_v1 = vsel %vm933_vm4, %v899_v35, %v5205_v18  ;;  %v914_v45 = vrot.slane %v3653_v37, 1 }
 0x1ad   : > { %v1017_v17 = vadd.f32 %v969_v41, %v3478_v19  ;;  %v1018_v54 = vadd.f32 %v966_v1, %v873_v62  ;;  %v3688_v55 = vadd.f32 %v683_v56, %v5200_v14  ;;  %v5206_v22 = vrot.slane %v3179_v11, 7 }
 0x1ae   : > { %v1019_v48 = vadd.f32 %v3306_v15, %v874_v12  ;;  %v5207_v27 = vrot.slane %v3404_v25, 7  ;;  %v5208_v50 = vrot.slane %v3179_v11, 1  ;;  %v5209_v15 = vrot.slane %v3404_v25, 1 }
 0x1af   : > { %v1449_v32 = vsub.f32 %v1401_v20, %v1017_v17  ;;  %v1110_v19 = vsel %vm788_vm3, %v1044_v29, %v5206_v22  ;;  %v1450_v62 = vsub.f32 %v1402_v23, %v1018_v54  ;;  %v767_v18 = vrot.slane %v3653_v37, 7 }
 0x1b0   : > { %v1113_v35 = vsel %vm788_vm3, %v5207_v27, %v1044_v29  ;;  %v1206_v28 = vsel %vm933_vm4, %v1140_v0, %v5208_v50  ;;  %v1209_v20 = vsel %vm933_vm4, %v5209_v15, %v1140_v0  ;;  %v1259_v41 = vadd.f32 %v3329_v4, %v1110_v19 }
 0x1b1   : > { %v1257_v56 = vadd.f32 %v1209_v20, %v3474_v5  ;;  %v1258_v58 = vadd.f32 %v1206_v28, %v1113_v35  ;;  %v1451_v12 = vsub.f32 %v1403_v9, %v1019_v48  ;;  %v1628_v17 = vand.u32 2147483647, %v1449_v32 }
 0x1b2   : > { %v5210_v1 = vrot.slane %v3481_v40, 1  ;;  %v1307_v0 = vmul.f32 0.5, %v1259_v41  ;;  %v1629_v50 = vand.u32 2147483647, %v1450_v62  ;;  %v1832_v5 = vmul.f32 %v2848_v57, %v1784_v60 }
 0x1b3   : > { %v1305_v22 = vmul.f32 0.5, %v1257_v56  ;;  %v1306_v27 = vmul.f32 0.5, %v1258_v58  ;;  %v1630_v35 = vand.u32 2147483647, %v1451_v12  ;;  %v1676_v4 = vmul.f32 %v2848_v57, %v1628_v17 }
 0x1b4   : > { %v954_v29 = vsel %vm933_vm4, %v5210_v1, %v914_v45  ;;  %v1355_v54 = vadd.f32 %v1307_v0, %v3179_v11  ;;  %v1677_v48 = vmul.f32 %v2848_v57, %v1629_v50  ;;  %v809_v60 = vsel %vm788_vm3, %v764_v52, %v767_v18 }
 0x1b5   : > { %v1022_v32 = vadd.f32 %v954_v29, %v3576_v34  ;;  %v1353_v23 = vadd.f32 %v1305_v22, %v3404_v25  ;;  %v1354_v9 = vadd.f32 %v1306_v27, %v726_v53  ;;  %v1678_v19 = vmul.f32 %v2848_v57, %v1630_v35 }
 0x1b6   : > { %v1733_v28 = vadd.f32 %v3499_v59, %v1676_v4  ;;  %v1155_v34 = vrot.slane %v3688_v55, 1  ;;  %v1801_v53 = vand.u32 2147483647, %v1355_v54  ;;  %v664_v40 = vmul.f32 0.5, %v3641_v26 }
 0x1b7   : > { %v1799_v15 = vand.u32 2147483647, %v1353_v23  ;;  %v1800_v25 = vand.u32 2147483647, %v1354_v9  ;;  %v1454_v11 = vsub.f32 %v3649_v3, %v1022_v32  ;;  %v757_v56 = vrot.slane %v3660_v31, 7  ;;  %v463_v32 = vpop.permute.xlu0 %462 }
 0x1b8   : > { %v1734_v20 = vadd.f32 %v1733_v28, %v1677_v48  ;;  %v1194_v59 = vsel %vm933_vm4, %v1152_v24, %v1155_v34  ;;  %v3740_v52 = vadd.f32 %v3623_v13, %v1832_v5  ;;  %v3744_v41 = vadd.f32 %v809_v60, %v3653_v37 }
 0x1b9   : > { %v1847_v58 = vmul.f32 %v2848_v57, %v1799_v15  ;;  %v1262_v3 = vadd.f32 %v1194_v59, %v3590_v16  ;;  %v1848_v12 = vmul.f32 %v2848_v57, %v1800_v25  ;;  %v1059_v17 = vrot.slane %v3688_v55, 7  ;;  %v5215_v15 = vld [vmem:[#allocation48_spill] sm:$0xff] }
 0x1ba   : > { %v1735_v62 = vadd.f32 %v1734_v20, %v1678_v19  ;;  %v3750_v24 = vadd.f32 %v664_v40, %v5201_v30  ;;  %v1849_v26 = vmul.f32 %v2848_v57, %v1801_v53  ;;  %v904_v29 = vrot.slane %v3660_v31, 1 }
 0x1bb   : > { %v1904_v13 = vadd.f32 %v3629_v21, %v1847_v58  ;;  %v1310_v1 = vmul.f32 0.5, %v1262_v3  ;;  %v1633_v27 = vand.u32 2147483647, %v1454_v11  ;;  %v5211_v16 = vrot.slane %v3556_v36, 7  ;;  %v535_v11 = vpop.permute.xlu2 %534 }
 0x1bc   : > { %v1736_v22 = vadd.f32 %v1735_v62, %v3436_v63  ;;  %v1145_v50 = vrot.slane %v3750_v24, 1  ;;  %v5212_v21 = vrot.slane %v3556_v36, 1  ;;  %v1862_v4 = vadd.f32 %v3269_v43, %v3153_v33  ;;  %v5217_v62 = vld [vmem:[#allocation86_spill] sm:$0xff] }
 0x1bd   : > { %v817_v0 = vsel %vm788_vm3, %v5211_v16, %v757_v56  ;;  %v1905_v5 = vadd.f32 %v1904_v13, %v1848_v12  ;;  %v1358_v35 = vadd.f32 %v1310_v1, %v3496_v8  ;;  %v5213_v23 = vrot.slane %v3496_v8, 7 }
 0x1be   : > { %v962_v63 = vsel %vm933_vm4, %v5212_v21, %v904_v29  ;;  %v1049_v48 = vrot.slane %v3750_v24, 7  ;;  %v5214_v36 = vrot.slane %v3563_v6, 1  ;;  %v1737_v19 = vadd.f32 %v1736_v22, %v3603_v51 }
 0x1bf   : > { %v3778_v9 = vsel %vm788_vm3, %v5213_v23, %v1059_v17  ;;  %v1003_v54 = vadd.f32 %v962_v63, %v3606_v42  ;;  %v1906_v43 = vadd.f32 %v1905_v5, %v1849_v26  ;;  %v3791_v28 = vadd.f32 %v1862_v4, %v3083_v7  ;;  %v5216_v7 = vld [vmem:[#allocation11_spill] sm:$0xff]  ;;  %v5219_v26 = vld [vmem:[#allocation72_spill] sm:$0xff] }
 0x1c0   : > { %v1202_v33 = vsel %vm933_vm4, %v5214_v36, %v1145_v50  ;;  %v3794_v60 = vadd.f32 %v817_v0, %v3660_v31  ;;  %v552_v25 = vadd.f32 %v463_v32, %v5215_v15  ;;  %v1691_v53 = vadd.f32 %v3247_v49, %v3073_v46  ;;  %v5221_v4 = vld [vmem:[#allocation76_spill] sm:$0xff]  ;;  %v497_v36 = vpop.permute.xlu1 %496 }
 0x1c1   : > { %v1243_v8 = vadd.f32 %v1202_v33, %v3614_v44  ;;  %v1435_v42 = vsub.f32 %v3656_v61, %v1003_v54  ;;  %v1907_v20 = vadd.f32 %v1906_v43, %v3637_v47  ;;  %v1681_v51 = vmul.f32 %v2848_v57, %v1633_v27 }
 0x1c2   : > { %v1804_v59 = vand.u32 2147483647, %v1358_v35  ;;  %v3803_v58 = vadd.f32 %v552_v25, %v5216_v7  ;;  %v648_v3 = vmul.f32 0.5, %v552_v25  ;;  %v1692_v12 = vadd.f32 %v1691_v53, %v5217_v62  ;;  %v5220_v35 = vld [vmem:[#allocation41_spill] sm:$0xff] }
 0x1c3   : > { %v1291_v44 = vmul.f32 0.5, %v1243_v8  ;;  %v1614_v40 = vand.u32 2147483647, %v1435_v42  ;;  %v3806_v61 = vadd.f32 %v1737_v19, %v1681_v51  ;;  %v5218_v46 = vrot.slane %v3563_v6, 7  ;;  %v5224_v19 = vld [vmem:[#allocation84_spill] sm:$0xff] }
 0x1c4   : > { %v588_v13 = vadd.f32 %v535_v11, %v5219_v26  ;;  %v1908_v1 = vadd.f32 %v1907_v20, %v3644_v2  ;;  %v3820_v22 = vadd.f32 %v648_v3, %v5216_v7  ;;  %v756_v27 = vrot.slane %v3803_v58, 7  ;;  %v5225_v20 = vld [vmem:[#allocation77_spill] sm:$0xff] }
 0x1c5   : > { %v3814_v49 = vsel %vm788_vm3, %v5218_v46, %v1049_v48  ;;  %v1339_v47 = vadd.f32 %v1291_v44, %v3563_v6  ;;  %v903_v16 = vrot.slane %v3803_v58, 1  ;;  %v1852_v0 = vmul.f32 %v2848_v57, %v1804_v59 }
 0x1c6   : > { %v1662_v5 = vmul.f32 %v2848_v57, %v1614_v40  ;;  %v3827_v21 = vadd.f32 %v588_v13, %v5220_v35  ;;  %v684_v63 = vmul.f32 0.5, %v588_v13  ;;  %v5222_v2 = vrot.slane %v5221_v4, 1  ;;  %v5227_v40 = vld [vmem:[#allocation51_spill] sm:$0xff] }
 0x1c7   : > { %v1785_v6 = vand.u32 2147483647, %v1339_v47  ;;  %v1407_v23 = vmul.f32 9.0, %v5200_v14  ;;  %v3837_v54 = vmul.f32 9.0, %v5201_v30  ;;  %v5223_v33 = vrot.slane %v5221_v4, 7  ;;  %v5228_v47 = vld [vmem:[#allocation85_spill] sm:$0xff] }
 0x1c8   : > { %v961_v32 = vsel %vm933_vm4, %v5222_v2, %v903_v16  ;;  %v1048_v42 = vrot.slane %v3820_v22, 7  ;;  %v1144_v15 = vrot.slane %v3820_v22, 1  ;;  %v3848_v25 = vadd.f32 %v1908_v1, %v1852_v0 }
 0x1c9   : > { %v816_v43 = vsel %vm788_vm3, %v5223_v33, %v756_v27  ;;  %v987_v8 = vadd.f32 %v961_v32, %v5224_v19  ;;  %v3851_v14 = vadd.f32 %v684_v63, %v5220_v35  ;;  %v770_v30 = vrot.slane %v3827_v21, 7  ;;  %v465_v32 = vpop.permute.xlu0 %464 }
 0x1ca   : > { %v917_v53 = vrot.slane %v3827_v21, 1  ;;  %v3856_v11 = vadd.f32 %v3665_v39, %v1662_v5  ;;  %v5226_v51 = vrot.slane %v5225_v20, 1  ;;  %v569_v3 = vadd.f32 %v497_v36, %v5227_v40  ;;  %v5231_v40 = vld [vmem:[#allocation47_spill] sm:$0xff] }
 0x1cb   : > { %v1419_v44 = vsub.f32 %v3663_v38, %v987_v8  ;;  %v1833_v62 = vmul.f32 %v2848_v57, %v1785_v6  ;;  %v843_v46 = vadd.f32 %v816_v43, %v3803_v58  ;;  %v5229_v13 = vrot.slane %v5225_v20, 7  ;;  %v5230_v6 = vld [vmem:[#allocation20_spill] sm:$0xff] }
 0x1cc   : > { %v1201_v59 = vsel %vm933_vm4, %v5226_v51, %v1144_v15  ;;  %v951_v39 = vsel %vm933_vm4, %v914_v45, %v917_v53  ;;  %v1158_v5 = vrot.slane %v3851_v14, 1  ;;  %v806_v45 = vsel %vm788_vm3, %v767_v18, %v770_v30 }
 0x1cd   : > { %v1227_v26 = vadd.f32 %v1201_v59, %v5228_v47  ;;  %v3881_v38 = vsel %vm788_vm3, %v5229_v13, %v1048_v42  ;;  %v1598_v1 = vand.u32 2147483647, %v1419_v44  ;;  %v1023_v0 = vadd.f32 %v951_v39, %v3744_v41 }
 0x1ce   : > { %v3892_v4 = vadd.f32 %v569_v3, %v5230_v6  ;;  %v665_v2 = vmul.f32 0.5, %v569_v3  ;;  %v1062_v33 = vrot.slane %v3851_v14, 7  ;;  %v1191_v41 = vsel %vm933_vm4, %v1155_v34, %v1158_v5 }
 0x1cf   : > { %v1275_v63 = vmul.f32 0.5, %v1227_v26  ;;  %v1646_v36 = vmul.f32 %v2848_v57, %v1598_v1  ;;  %v1455_v37 = vsub.f32 %v1407_v23, %v1023_v0  ;;  %v1263_v18 = vadd.f32 %v1191_v41, %v3778_v9 }
 0x1d0   : > { %v3905_v19 = vadd.f32 %v665_v2, %v5230_v6  ;;  %v760_v8 = vrot.slane %v3892_v4, 7  ;;  %v907_v44 = vrot.slane %v3892_v4, 1  ;;  %v553_v3 = vadd.f32 %v465_v32, %v5231_v40 }
 0x1d1   : > { %v1323_v43 = vadd.f32 %v1275_v63, %v5225_v20  ;;  %v3908_v51 = vadd.f32 %v1692_v12, %v1646_v36  ;;  %v1634_v59 = vand.u32 2147483647, %v1455_v37  ;;  %v3913_v47 = vadd.f32 %v3740_v52, %v1833_v62  ;;  %v537_v63 = vpop.permute.xlu2 %536 }
 0x1d2   : > { %v879_v23 = vadd.f32 %v806_v45, %v3827_v21  ;;  %v1311_v20 = vmul.f32 0.5, %v1263_v18  ;;  %v3922_v9 = vsel %vm788_vm3, %v1059_v17, %v1062_v33  ;;  %v814_v52 = vsel %vm788_vm3, %v757_v56, %v760_v8  ;;  %v5232_v56 = vld [vmem:[#allocation10_spill] sm:$0xff]  ;;  %v5233_v18 = vld [vmem:[#allocation71_spill] sm:$0xff] }
 0x1d3   : > { %v1769_v34 = vand.u32 2147483647, %v1323_v43  ;;  %v959_v12 = vsel %vm933_vm4, %v904_v29, %v907_v44  ;;  %v1148_v62 = vrot.slane %v3905_v19, 1  ;;  %v1052_v13 = vrot.slane %v3905_v19, 7 }
 0x1d4   : > { %v1359_v17 = vadd.f32 %v1311_v20, %v3688_v55  ;;  %v1004_v39 = vadd.f32 %v959_v12, %v3794_v60  ;;  %v1682_v1 = vmul.f32 %v2848_v57, %v1634_v59  ;;  %v3949_v29 = vadd.f32 %v553_v3, %v5232_v56 }
 0x1d5   : > { %v1817_v26 = vmul.f32 %v2848_v57, %v1769_v34  ;;  %v1199_v31 = vsel %vm933_vm4, %v1145_v50, %v1148_v62  ;;  %v649_v0 = vmul.f32 0.5, %v553_v3  ;;  %v1372_v32 = vmul.f32 9.0, %v5216_v7 }
 0x1d6   : > { %v1805_v60 = vand.u32 2147483647, %v1359_v17  ;;  %v1244_v45 = vadd.f32 %v1199_v31, %v3814_v49  ;;  %v1436_v2 = vsub.f32 %v3837_v54, %v1004_v39  ;;  %v759_v50 = vrot.slane %v3949_v29, 7 }
 0x1d7   : > { %v3952_v55 = vadd.f32 %v3791_v28, %v1817_v26  ;;  %v3958_v36 = vadd.f32 %v649_v0, %v5232_v56  ;;  %v906_v41 = vrot.slane %v3949_v29, 1  ;;  %v3963_v37 = vadd.f32 %v814_v52, %v3892_v4  ;;  %v499_v26 = vpop.permute.xlu1 %498 }
 0x1d8   : > { %v1292_v43 = vmul.f32 0.5, %v1244_v45  ;;  %v1615_v28 = vand.u32 2147483647, %v1436_v2  ;;  %v589_v59 = vadd.f32 %v537_v63, %v5233_v18  ;;  %v1853_v49 = vmul.f32 %v2848_v57, %v1805_v60  ;;  %v5235_v45 = vld [vmem:[#allocation61_spill] sm:$0xff] }
 0x1d9   : > { %v3973_v7 = vsel %vm788_vm3, %v1049_v48, %v1052_v13  ;;  %v958_v54 = vsel %vm933_vm4, %v903_v16, %v906_v41  ;;  %v1147_v40 = vrot.slane %v3958_v36, 1  ;;  %v3983_v3 = vadd.f32 %v3806_v61, %v1682_v1 }
 0x1da   : > { %v1340_v34 = vadd.f32 %v1292_v43, %v3750_v24  ;;  %v813_v48 = vsel %vm788_vm3, %v756_v27, %v759_v50  ;;  %v1051_v20 = vrot.slane %v3958_v36, 7  ;;  %v1663_v52 = vmul.f32 %v2848_v57, %v1615_v28  ;;  %v5234_v24 = vld [vmem:[#allocation40_spill] sm:$0xff]  ;;  %v467_v43 = vpop.permute.xlu0 %466 }
 0x1db   : > { %v988_v12 = vadd.f32 %v958_v54, %v843_v46  ;;  %v1198_v61 = vsel %vm933_vm4, %v1144_v15, %v1147_v40  ;;  %v4001_v16 = vadd.f32 %v589_v59, %v5234_v24  ;;  %v1408_v27 = vmul.f32 9.0, %v5220_v35 }
 0x1dc   : > { %v1786_v58 = vand.u32 2147483647, %v1340_v34  ;;  %v1228_v17 = vadd.f32 %v1198_v61, %v3881_v38  ;;  %v685_v39 = vmul.f32 0.5, %v589_v59  ;;  %v4006_v1 = vadd.f32 %v3848_v25, %v1853_v49 }
 0x1dd   : > { %v1420_v46 = vsub.f32 %v1372_v32, %v988_v12  ;;  %v773_v31 = vrot.slane %v4001_v16, 7  ;;  %v920_v0 = vrot.slane %v4001_v16, 1  ;;  %v844_v15 = vadd.f32 %v813_v48, %v3949_v29 }
 0x1de   : > { %v1276_v63 = vmul.f32 0.5, %v1228_v17  ;;  %v4012_v60 = vadd.f32 %v685_v39, %v5234_v24  ;;  %v570_v2 = vadd.f32 %v499_v26, %v5235_v45  ;;  %v4016_v38 = vadd.f32 %v3856_v11, %v1663_v52 }
 0x1df   : > { %v4024_v35 = vsel %vm788_vm3, %v1048_v42, %v1051_v20  ;;  %v1599_v25 = vand.u32 2147483647, %v1420_v46  ;;  %v948_v32 = vsel %vm933_vm4, %v917_v53, %v920_v0  ;;  %v1834_v11 = vmul.f32 %v2848_v57, %v1786_v58  ;;  %v5236_v53 = vld [vmem:[#allocation25_spill] sm:$0xff] }
 0x1e0   : > { %v1324_v28 = vadd.f32 %v1276_v63, %v3820_v22  ;;  %v1024_v18 = vadd.f32 %v948_v32, %v879_v23  ;;  %v1389_v59 = vmul.f32 9.0, %v5230_v6  ;;  %v803_v42 = vsel %vm788_vm3, %v770_v30, %v773_v31  ;;  %v5237_v23 = vld [vmem:[#allocation38_spill] sm:$0xff]  ;;  %v5238_v46 = vld [vmem:[#allocation9_spill] sm:$0xff] }
 0x1e1   : > { %v1647_v49 = vmul.f32 %v2848_v57, %v1599_v25  ;;  %v1161_v54 = vrot.slane %v4012_v60, 1  ;;  %v4044_v34 = vadd.f32 %v570_v2, %v5236_v53  ;;  %v666_v22 = vmul.f32 0.5, %v570_v2 }
 0x1e2   : > { %v1770_v48 = vand.u32 2147483647, %v1324_v28  ;;  %v1456_v52 = vsub.f32 %v1408_v27, %v1024_v18  ;;  %v554_v12 = vadd.f32 %v467_v43, %v5237_v23  ;;  %v1373_v61 = vmul.f32 9.0, %v5232_v56 }
 0x1e3   : > { %v4048_v6 = vadd.f32 %v3908_v51, %v1647_v49  ;;  %v1188_v21 = vsel %vm933_vm4, %v1158_v5, %v1161_v54  ;;  %v763_v30 = vrot.slane %v4044_v34, 7  ;;  %v4061_v27 = vadd.f32 %v666_v22, %v5236_v53 }
 0x1e4   : > { %v1818_v26 = vmul.f32 %v2848_v57, %v1770_v48  ;;  %v1264_v58 = vadd.f32 %v1188_v21, %v3922_v9  ;;  %v1635_v17 = vand.u32 2147483647, %v1456_v52  ;;  %v1065_v51 = vrot.slane %v4012_v60, 7  ;;  %v539_v48 = vpop.permute.xlu2 %538  ;;  %v501_v21 = vpop.permute.xlu1 %500 }
 0x1e5   : > { %v910_v39 = vrot.slane %v4044_v34, 1  ;;  %v4066_v63 = vadd.f32 %v554_v12, %v5238_v46  ;;  %v650_v5 = vmul.f32 0.5, %v554_v12  ;;  %v4069_v45 = vadd.f32 %v3913_v47, %v1834_v11 }
 0x1e6   : > { %v4072_v56 = vadd.f32 %v3952_v55, %v1818_v26  ;;  %v880_v9 = vadd.f32 %v803_v42, %v4001_v16  ;;  %v1312_v2 = vmul.f32 0.5, %v1264_v58  ;;  %v811_v25 = vsel %vm788_vm3, %v760_v8, %v763_v30 }
 0x1e7   : > { %v956_v47 = vsel %vm933_vm4, %v907_v44, %v910_v39  ;;  %v1151_v55 = vrot.slane %v4061_v27, 1  ;;  %v4089_v32 = vadd.f32 %v650_v5, %v5238_v46  ;;  %v1683_v11 = vmul.f32 %v2848_v57, %v1635_v17 }
 0x1e8   : > { %v1360_v43 = vadd.f32 %v1312_v2, %v3851_v14  ;;  %v1005_v28 = vadd.f32 %v956_v47, %v3963_v37  ;;  %v762_v8 = vrot.slane %v4066_v63, 7  ;;  %v1092_v4 = vsel %vm788_vm3, %v1062_v33, %v1065_v51 }
 0x1e9   : > { %v1055_v44 = vrot.slane %v4061_v27, 7  ;;  %v1196_v18 = vsel %vm933_vm4, %v1148_v62, %v1151_v55  ;;  %v909_v37 = vrot.slane %v4066_v63, 1  ;;  %v1054_v33 = vrot.slane %v4089_v32, 7 }
 0x1ea   : > { %v1245_v49 = vadd.f32 %v1196_v18, %v3973_v7  ;;  %v1437_v42 = vsub.f32 %v1389_v59, %v1005_v28  ;;  %v810_v14 = vsel %vm788_vm3, %v759_v50, %v762_v8  ;;  %v1806_v52 = vand.u32 2147483647, %v1360_v43  ;;  %v5241_v43 = vld [vmem:[#allocation60_spill] sm:$0xff] }
 0x1eb   : > { %v861_v22 = vadd.f32 %v811_v25, %v4044_v34  ;;  %v955_v62 = vsel %vm933_vm4, %v906_v41, %v909_v37  ;;  %v1150_v7 = vrot.slane %v4089_v32, 1  ;;  %v4126_v59 = vadd.f32 %v3983_v3, %v1683_v11  ;;  %v5239_v3 = vld [vmem:[#allocation66_spill] sm:$0xff]  ;;  %v5240_v25 = vld [vmem:[#allocation39_spill] sm:$0xff] }
 0x1ec   : > { %v1293_v23 = vmul.f32 0.5, %v1245_v49  ;;  %v1616_v50 = vand.u32 2147483647, %v1437_v42  ;;  %v989_v12 = vadd.f32 %v955_v62, %v844_v15  ;;  %v1100_v26 = vsel %vm788_vm3, %v1052_v13, %v1055_v44  ;;  %v5242_v42 = vld [vmem:[#allocation24_spill] sm:$0xff] }
 0x1ed   : > { %v4135_v29 = vadd.f32 %v810_v14, %v4066_v63  ;;  %v1195_v41 = vsel %vm933_vm4, %v1147_v40, %v1150_v7  ;;  %v590_v15 = vadd.f32 %v539_v48, %v5239_v3  ;;  %v4151_v13 = vsel %vm788_vm3, %v1051_v20, %v1054_v33 }
 0x1ee   : > { %v1341_v58 = vadd.f32 %v1293_v23, %v3905_v19  ;;  %v1229_v17 = vadd.f32 %v1195_v41, %v4024_v35  ;;  %v1421_v5 = vsub.f32 %v1373_v61, %v989_v12  ;;  %v4155_v2 = vmul.f32 %v2848_v57, %v1806_v52 }
 0x1ef   : > { %v4158_v40 = vadd.f32 %v590_v15, %v5240_v25  ;;  %v686_v47 = vmul.f32 0.5, %v590_v15  ;;  %v571_v19 = vadd.f32 %v501_v21, %v5241_v43  ;;  %v1664_v11 = vmul.f32 %v2848_v57, %v1616_v50 }
 0x1f0   : > { %v1787_v28 = vand.u32 2147483647, %v1341_v58  ;;  %v1277_v18 = vmul.f32 0.5, %v1229_v17  ;;  %v1600_v49 = vand.u32 2147483647, %v1421_v5  ;;  %v1409_v50 = vmul.f32 9.0, %v5234_v24  ;;  %v469_v58 = vpop.permute.xlu0 %468 }
 0x1f1   : > { %v4163_v20 = vadd.f32 %v686_v47, %v5240_v25  ;;  %v776_v35 = vrot.slane %v4158_v40, 7  ;;  %v923_v61 = vrot.slane %v4158_v40, 1  ;;  %v4168_v14 = vadd.f32 %v571_v19, %v5242_v42 }
 0x1f2   : > { %v1835_v48 = vmul.f32 %v2848_v57, %v1787_v28  ;;  %v1325_v52 = vadd.f32 %v1277_v18, %v3958_v36  ;;  %v1648_v62 = vmul.f32 %v2848_v57, %v1600_v49  ;;  %v667_v23 = vmul.f32 0.5, %v571_v19  ;;  %v5243_v19 = vld [vmem:[#allocation50_spill] sm:$0xff] }
 0x1f3   : > { %v945_v12 = vsel %vm933_vm4, %v920_v0, %v923_v61  ;;  %v1164_v21 = vrot.slane %v4163_v20, 1  ;;  %v1390_v41 = vmul.f32 9.0, %v5236_v53  ;;  %v4183_v3 = vadd.f32 %v4016_v38, %v1664_v11 }
 0x1f4   : > { %v1771_v36 = vand.u32 2147483647, %v1325_v52  ;;  %v800_v24 = vsel %vm788_vm3, %v773_v31, %v776_v35  ;;  %v1374_v15 = vmul.f32 9.0, %v5238_v46  ;;  %v1025_v17 = vadd.f32 %v945_v12, %v880_v9  ;;  %v541_v12 = vpop.permute.xlu2 %540 }
 0x1f5   : > { %v1068_v0 = vrot.slane %v4163_v20, 7  ;;  %v1185_v38 = vsel %vm933_vm4, %v1161_v54, %v1164_v21  ;;  %v4200_v53 = vadd.f32 %v667_v23, %v5242_v42  ;;  %v4203_v16 = vadd.f32 %v4069_v45, %v1835_v48 }
 0x1f6   : > { %v4206_v31 = vadd.f32 %v4048_v6, %v1648_v62  ;;  %v1265_v46 = vadd.f32 %v1185_v38, %v1092_v4  ;;  %v913_v9 = vrot.slane %v4168_v14, 1  ;;  %v1457_v5 = vsub.f32 %v1409_v50, %v1025_v17  ;;  %v5244_v62 = vld [vmem:[#allocation14_spill] sm:$0xff] }
 0x1f7   : > { %v766_v47 = vrot.slane %v4168_v14, 7  ;;  %v1154_v43 = vrot.slane %v4200_v53, 1  ;;  %v555_v11 = vadd.f32 %v469_v58, %v5243_v19  ;;  %v1819_v54 = vmul.f32 %v2848_v57, %v1771_v36  ;;  %v5245_v19 = vld [vmem:[#allocation75_spill] sm:$0xff] }
 0x1f8   : > { %v881_v28 = vadd.f32 %v800_v24, %v4158_v40  ;;  %v1313_v18 = vmul.f32 0.5, %v1265_v46  ;;  %v953_v6 = vsel %vm933_vm4, %v910_v39, %v913_v9  ;;  %v1089_v45 = vsel %vm788_vm3, %v1065_v51, %v1068_v0 }
 0x1f9   : > { %v1636_v4 = vand.u32 2147483647, %v1457_v5  ;;  %v1006_v49 = vadd.f32 %v953_v6, %v861_v22  ;;  %v1058_v48 = vrot.slane %v4200_v53, 7  ;;  %v1193_v39 = vsel %vm933_vm4, %v1151_v55, %v1154_v43 }
 0x1fa   : > { %v1361_v52 = vadd.f32 %v1313_v18, %v4012_v60  ;;  %v4235_v23 = vadd.f32 %v555_v11, %v5244_v62  ;;  %v651_v50 = vmul.f32 0.5, %v555_v11  ;;  %v808_v60 = vsel %vm788_vm3, %v763_v30, %v766_v47 }
 0x1fb   : > { %v1684_v51 = vmul.f32 %v2848_v57, %v1636_v4  ;;  %v1246_v22 = vadd.f32 %v1193_v39, %v1100_v26  ;;  %v1438_v36 = vsub.f32 %v1390_v41, %v1006_v49  ;;  %v4245_v24 = vadd.f32 %v4072_v56, %v1819_v54  ;;  %v5246_v4 = vld [vmem:[#allocation45_spill] sm:$0xff]  ;;  %v503_v49 = vpop.permute.xlu1 %502 }
 0x1fc   : > { %v4248_v55 = vadd.f32 %v651_v50, %v5244_v62  ;;  %v765_v58 = vrot.slane %v4235_v23, 7  ;;  %v912_v17 = vrot.slane %v4235_v23, 1  ;;  %v1807_v38 = vand.u32 2147483647, %v1361_v52 }
 0x1fd   : > { %v1294_v46 = vmul.f32 0.5, %v1246_v22  ;;  %v1617_v5 = vand.u32 2147483647, %v1438_v36  ;;  %v591_v34 = vadd.f32 %v541_v12, %v5245_v19  ;;  %v862_v11 = vadd.f32 %v808_v60, %v4168_v14  ;;  %v5247_v22 = vld [vmem:[#allocation54_spill] sm:$0xff] }
 0x1fe   : > { %v4260_v30 = vsel %vm788_vm3, %v1055_v44, %v1058_v48  ;;  %v952_v56 = vsel %vm933_vm4, %v909_v37, %v912_v17  ;;  %v1410_v26 = vmul.f32 9.0, %v5240_v25  ;;  %v4270_v41 = vadd.f32 %v4126_v59, %v1684_v51 }
 0x1ff   : > { %v1342_v54 = vadd.f32 %v1294_v46, %v4061_v27  ;;  %v807_v44 = vsel %vm788_vm3, %v762_v8, %v765_v58  ;;  %v990_v18 = vadd.f32 %v952_v56, %v4135_v29  ;;  %v1057_v6 = vrot.slane %v4248_v55, 7 }
 0x200   : > { %v1153_v37 = vrot.slane %v4248_v55, 1  ;;  %v4283_v25 = vadd.f32 %v591_v34, %v5246_v4  ;;  %v687_v59 = vmul.f32 0.5, %v591_v34  ;;  %v4286_v27 = vmul.f32 %v2848_v57, %v1807_v38 }
 0x201   : > { %v1665_v52 = vmul.f32 %v2848_v57, %v1617_v5  ;;  %v1788_v63 = vand.u32 2147483647, %v1342_v54  ;;  %v1422_v39 = vsub.f32 %v1374_v15, %v990_v18  ;;  %v4290_v8 = vadd.f32 %v807_v44, %v4235_v23  ;;  %v5248_v44 = vld [vmem:[#allocation23_spill] sm:$0xff] }
 0x202   : > { %v1192_v29 = vsel %vm933_vm4, %v1150_v7, %v1153_v37  ;;  %v4299_v50 = vadd.f32 %v687_v59, %v5246_v4  ;;  %v926_v12 = vrot.slane %v4283_v25, 1  ;;  %v779_v15 = vrot.slane %v4283_v25, 7 }
 0x203   : > { %v1230_v51 = vadd.f32 %v1192_v29, %v4151_v13  ;;  %v1601_v60 = vand.u32 2147483647, %v1422_v39  ;;  %v572_v36 = vadd.f32 %v503_v49, %v5247_v22  ;;  %v1836_v38 = vmul.f32 %v2848_v57, %v1788_v63 }
 0x204   : > { %v4312_v7 = vsel %vm788_vm3, %v1054_v33, %v1057_v6  ;;  %v942_v13 = vsel %vm933_vm4, %v923_v61, %v926_v12  ;;  %v1167_v46 = vrot.slane %v4299_v50, 1  ;;  %v4322_v5 = vadd.f32 %v4183_v3, %v1665_v52  ;;  %v471_v3 = vpop.permute.xlu0 %470 }
 0x205   : > { %v1278_v19 = vmul.f32 0.5, %v1230_v51  ;;  %v1071_v34 = vrot.slane %v4299_v50, 7  ;;  %v1391_v56 = vmul.f32 9.0, %v5242_v42  ;;  %v1649_v33 = vmul.f32 %v2848_v57, %v1601_v60  ;;  %v5249_v60 = vld [vmem:[#allocation49_spill] sm:$0xff] }
 0x206   : > { %v1026_v54 = vadd.f32 %v942_v13, %v881_v28  ;;  %v1182_v61 = vsel %vm933_vm4, %v1164_v21, %v1167_v46  ;;  %v4334_v18 = vadd.f32 %v572_v36, %v5248_v44  ;;  %v797_v42 = vsel %vm788_vm3, %v776_v35, %v779_v15 }
 0x207   : > { %v1326_v59 = vadd.f32 %v1278_v19, %v4089_v32  ;;  %v1266_v28 = vadd.f32 %v1182_v61, %v1089_v45  ;;  %v668_v49 = vmul.f32 0.5, %v572_v36  ;;  %v4344_v52 = vadd.f32 %v4203_v16, %v1836_v38 }
 0x208   : > { %v1458_v63 = vsub.f32 %v1410_v26, %v1026_v54  ;;  %v769_v21 = vrot.slane %v4334_v18, 7  ;;  %v916_v39 = vrot.slane %v4334_v18, 1  ;;  %v556_v40 = vadd.f32 %v471_v3, %v5249_v60  ;;  %v543_v3 = vpop.permute.xlu2 %542 }
 0x209   : > { %v1772_v29 = vand.u32 2147483647, %v1326_v59  ;;  %v1314_v51 = vmul.f32 0.5, %v1266_v28  ;;  %v4349_v32 = vadd.f32 %v668_v49, %v5248_v44  ;;  %v4353_v22 = vadd.f32 %v4206_v31, %v1649_v33  ;;  %v5250_v33 = vld [vmem:[#allocation13_spill] sm:$0xff] }
 0x20a   : > { %v4356_v35 = vadd.f32 %v797_v42, %v4283_v25  ;;  %v4364_v16 = vsel %vm788_vm3, %v1068_v0, %v1071_v34  ;;  %v950_v45 = vsel %vm933_vm4, %v913_v9, %v916_v39  ;;  %v805_v26 = vsel %vm788_vm3, %v766_v47, %v769_v21 }
 0x20b   : > { %v1362_v31 = vadd.f32 %v1314_v51, %v4163_v20  ;;  %v1007_v36 = vadd.f32 %v950_v45, %v862_v11  ;;  %v1375_v0 = vmul.f32 9.0, %v5244_v62  ;;  %v1820_v38 = vmul.f32 %v2848_v57, %v1772_v29  ;;  %v5251_v29 = vld [vmem:[#allocation74_spill] sm:$0xff]  ;;  %v5252_v45 = vld [vmem:[#allocation44_spill] sm:$0xff] }
 0x20c   : > { %v1637_v13 = vand.u32 2147483647, %v1458_v63  ;;  %v1157_v19 = vrot.slane %v4349_v32, 1  ;;  %v4383_v54 = vadd.f32 %v556_v40, %v5250_v33  ;;  %v1061_v20 = vrot.slane %v4349_v32, 7 }
 0x20d   : > { %v1439_v9 = vsub.f32 %v1391_v56, %v1007_v36  ;;  %v652_v61 = vmul.f32 0.5, %v556_v40  ;;  %v4387_v14 = vmul.f32 9.0, %v5246_v4  ;;  %v4390_v47 = vadd.f32 %v805_v26, %v4334_v18 }
 0x20e   : > { %v1190_v62 = vsel %vm933_vm4, %v1154_v43, %v1157_v19  ;;  %v768_v11 = vrot.slane %v4383_v54, 7  ;;  %v915_v59 = vrot.slane %v4383_v54, 1  ;;  %v1808_v56 = vand.u32 2147483647, %v1362_v31 }
 0x20f   : > { %v1247_v42 = vadd.f32 %v1190_v62, %v4260_v30  ;;  %v1618_v4 = vand.u32 2147483647, %v1439_v9  ;;  %v4402_v28 = vadd.f32 %v652_v61, %v5250_v33  ;;  %v4405_v49 = vadd.f32 %v4245_v24, %v1820_v38 }
 0x210   : > { %v4408_v63 = vmul.f32 %v2848_v57, %v1637_v13  ;;  %v949_v43 = vsel %vm933_vm4, %v912_v17, %v915_v59  ;;  %v592_v51 = vadd.f32 %v543_v3, %v5251_v29  ;;  %v4423_v24 = vsel %vm788_vm3, %v1058_v48, %v1061_v20 }
 0x211   : > { %v1295_v30 = vmul.f32 0.5, %v1247_v42  ;;  %v804_v60 = vsel %vm788_vm3, %v765_v58, %v768_v11  ;;  %v991_v17 = vadd.f32 %v949_v43, %v4290_v8  ;;  %v1156_v40 = vrot.slane %v4402_v28, 1  ;;  %v5253_v42 = vld [vmem:[#allocation79_spill] sm:$0xff] }
 0x212   : > { %v1412_v31 = vmul.f32 9.0, %v5252_v45  ;;  %v640_v26 = vadd.f32 %v592_v51, %v5252_v45  ;;  %v688_v36 = vmul.f32 0.5, %v592_v51  ;;  %v1666_v38 = vmul.f32 %v2848_v57, %v1618_v4 }
 0x213   : > { %v1343_v48 = vadd.f32 %v1295_v30, %v4200_v53  ;;  %v1423_v13 = vsub.f32 %v1375_v0, %v991_v17  ;;  %v1856_v9 = vmul.f32 %v2848_v57, %v1808_v56  ;;  %v4439_v23 = vadd.f32 %v804_v60, %v4383_v54  ;;  %v505_v17 = vpop.permute.xlu1 %504 }
 0x214   : > { %v1189_v58 = vsel %vm933_vm4, %v1153_v37, %v1156_v40  ;;  %v736_v8 = vadd.f32 %v688_v36, %v5252_v45  ;;  %v782_v61 = vrot.slane %v640_v26, 7  ;;  %v929_v0 = vrot.slane %v640_v26, 1 }
 0x215   : > { %v1789_v3 = vand.u32 2147483647, %v1343_v48  ;;  %v1231_v53 = vadd.f32 %v1189_v58, %v4312_v7  ;;  %v1602_v62 = vand.u32 2147483647, %v1423_v13  ;;  %v5254_v56 = vrot.slane %v5253_v42, 7 }
 0x216   : > { %v794_v43 = vsel %vm788_vm3, %v779_v15, %v782_v61  ;;  %v1074_v29 = vrot.slane %v736_v8, 7  ;;  %v1170_v37 = vrot.slane %v736_v8, 1  ;;  %v4458_v51 = vadd.f32 %v4322_v5, %v1666_v38  ;;  %v5255_v15 = vld [vmem:[#allocation80_spill] sm:$0xff] }
 0x217   : > { %v791_v4 = vsel %vm788_vm3, %v782_v61, %v5254_v56  ;;  %v1060_v30 = vrot.slane %v4402_v28, 7  ;;  %v1279_v7 = vmul.f32 0.5, %v1231_v53  ;;  %v883_v60 = vadd.f32 %v794_v43, %v640_v26  ;;  %v5258_v53 = vld [vmem:[#allocation81_spill] sm:$0xff]  ;;  %v5260_v43 = vld [vmem:[#allocation83_spill] sm:$0xff] }
 0x218   : > { %v1837_v45 = vmul.f32 %v2848_v57, %v1789_v3  ;;  %v884_v36 = vadd.f32 %v791_v4, %v5253_v42  ;;  %v939_v48 = vsel %vm933_vm4, %v926_v12, %v929_v0  ;;  %v5256_v13 = vrot.slane %v5255_v15, 7 }
 0x219   : > { %v1327_v38 = vadd.f32 %v1279_v7, %v4248_v55  ;;  %v1650_v58 = vmul.f32 %v2848_v57, %v1602_v62  ;;  %v5257_v26 = vrot.slane %v5253_v42, 1  ;;  %v1027_v3 = vadd.f32 %v939_v48, %v4356_v35 }
 0x21a   : > { %v1080_v5 = vsel %vm788_vm3, %v1074_v29, %v5256_v13  ;;  %v4479_v56 = vadd.f32 %v5258_v53, %v884_v36  ;;  %v1083_v12 = vsel %vm788_vm3, %v1071_v34, %v1074_v29  ;;  %v5259_v4 = vrot.slane %v5255_v15, 1  ;;  %v473_v13 = vpop.permute.xlu0 %472  ;;  %v5263_v53 = vld [vmem:[#allocation28_spill] sm:$0xff] }
 0x21b   : > { %v936_v61 = vsel %vm933_vm4, %v929_v0, %v5257_v26  ;;  %v1773_v42 = vand.u32 2147483647, %v1327_v38  ;;  %v1179_v35 = vsel %vm933_vm4, %v1167_v46, %v1170_v37  ;;  %v1269_v7 = vadd.f32 %v5260_v43, %v1080_v5  ;;  %v5261_v5 = vld [vmem:[#allocation63_spill] sm:$0xff] }
 0x21c   : > { %v1028_v25 = vadd.f32 %v936_v61, %v883_v60  ;;  %v1176_v62 = vsel %vm933_vm4, %v1170_v37, %v5259_v4  ;;  %v1267_v60 = vadd.f32 %v1179_v35, %v4364_v16  ;;  %v1459_v36 = vsub.f32 %v4387_v14, %v1027_v3  ;;  %v5262_v3 = vld [vmem:[#allocation42_spill] sm:$0xff] }
 0x21d   : > { %v1268_v0 = vadd.f32 %v1176_v62, %v1083_v12  ;;  %v1911_v34 = vadd.f32 %v4006_v1, %v4155_v2  ;;  %v4499_v29 = vadd.f32 %v4344_v52, %v1837_v45  ;;  %v4507_v46 = vsel %vm788_vm3, %v1057_v6, %v1060_v30 }
 0x21e   : > { %v1460_v48 = vsub.f32 %v1412_v31, %v1028_v25  ;;  %v1821_v37 = vmul.f32 %v2848_v57, %v1773_v42  ;;  %v4511_v14 = vadd.f32 %v4353_v22, %v1650_v58  ;;  %v1315_v31 = vmul.f32 0.5, %v1267_v60 }
 0x21f   : > { %v1316_v16 = vmul.f32 0.5, %v1268_v0  ;;  %v4513_v1 = vmul.f32 0.5, %v1269_v7  ;;  %v1912_v2 = vadd.f32 %v1911_v34, %v4286_v27  ;;  %v1638_v45 = vand.u32 2147483647, %v1459_v36  ;;  %v507_v27 = vpop.permute.xlu1 %506 }
 0x220   : > { %v1392_v55 = vmul.f32 9.0, %v5248_v44  ;;  %v573_v38 = vadd.f32 %v505_v17, %v5261_v5  ;;  %v1363_v6 = vadd.f32 %v1315_v31, %v4299_v50  ;;  %v1639_v26 = vand.u32 2147483647, %v1460_v48  ;;  %v5264_v44 = vld [vmem:[#allocation12_spill] sm:$0xff] }
 0x221   : > { %v1364_v52 = vadd.f32 %v1316_v16, %v736_v8  ;;  %v1913_v61 = vadd.f32 %v1912_v2, %v1856_v9  ;;  %v557_v25 = vadd.f32 %v473_v13, %v5262_v3  ;;  %v4521_v22 = vadd.f32 %v4405_v49, %v1821_v37 }
 0x222   : > { %v621_v12 = vadd.f32 %v573_v38, %v5263_v53  ;;  %v669_v4 = vmul.f32 0.5, %v573_v38  ;;  %v1809_v8 = vand.u32 2147483647, %v1363_v6  ;;  %v1376_v62 = vmul.f32 9.0, %v5250_v33  ;;  %v5265_v33 = vld [vmem:[#allocation62_spill] sm:$0xff] }
 0x223   : > { %v1810_v58 = vand.u32 2147483647, %v1364_v52  ;;  %v4526_v42 = vadd.f32 %v557_v25, %v5264_v44  ;;  %v653_v17 = vmul.f32 0.5, %v557_v25  ;;  %v4529_v50 = vmul.f32 %v2848_v57, %v1638_v45  ;;  %v475_v45 = vpop.permute.xlu0 %474 }
 0x224   : > { %v4532_v9 = vadd.f32 %v669_v4, %v5263_v53  ;;  %v772_v49 = vrot.slane %v621_v12, 7  ;;  %v919_v35 = vrot.slane %v621_v12, 1  ;;  %v4535_v0 = vmul.f32 %v2848_v57, %v1639_v26 }
 0x225   : > { %v1857_v43 = vmul.f32 %v2848_v57, %v1809_v8  ;;  %v918_v7 = vrot.slane %v4526_v42, 1  ;;  %v574_v60 = vadd.f32 %v507_v27, %v5265_v33  ;;  %v1858_v36 = vmul.f32 %v2848_v57, %v1810_v58 }
 0x226   : > { %v947_v48 = vsel %vm933_vm4, %v916_v39, %v919_v35  ;;  %v1160_v34 = vrot.slane %v4532_v9, 1  ;;  %v4547_v37 = vadd.f32 %v653_v17, %v5264_v44  ;;  %v802_v13 = vsel %vm788_vm3, %v769_v21, %v772_v49 }
 0x227   : > { %v1914_v16 = vadd.f32 %v1913_v61, %v1857_v43  ;;  %v1008_v31 = vadd.f32 %v947_v48, %v4390_v47  ;;  %v771_v2 = vrot.slane %v4526_v42, 7  ;;  %v1064_v52 = vrot.slane %v4532_v9, 7  ;;  %v5266_v61 = vld [vmem:[#allocation27_spill] sm:$0xff]  ;;  %v509_v48 = vpop.permute.xlu1 %508 }
 0x228   : > { %v1187_v39 = vsel %vm933_vm4, %v1157_v19, %v1160_v34  ;;  %v946_v18 = vsel %vm933_vm4, %v915_v59, %v918_v7  ;;  %v1393_v21 = vmul.f32 9.0, %v5263_v53  ;;  %v864_v26 = vadd.f32 %v802_v13, %v621_v12 }
 0x229   : > { %v4567_v47 = vadd.f32 %v1914_v16, %v1858_v36  ;;  %v1248_v5 = vadd.f32 %v1187_v39, %v4423_v24  ;;  %v1440_v38 = vsub.f32 %v1392_v55, %v1008_v31  ;;  %v992_v6 = vadd.f32 %v946_v18, %v4439_v23 }
 0x22a   : > { %v1159_v19 = vrot.slane %v4547_v37, 1  ;;  %v4573_v3 = vadd.f32 %v574_v60, %v5266_v61  ;;  %v670_v25 = vmul.f32 0.5, %v574_v60  ;;  %v801_v59 = vsel %vm788_vm3, %v768_v11, %v771_v2 }
 0x22b   : > { %v1296_v58 = vmul.f32 0.5, %v1248_v5  ;;  %v1619_v4 = vand.u32 2147483647, %v1440_v38  ;;  %v1424_v24 = vsub.f32 %v1376_v62, %v992_v6  ;;  %v1063_v55 = vrot.slane %v4547_v37, 7  ;;  %v5267_v38 = vld [vmem:[#allocation53_spill] sm:$0xff] }
 0x22c   : > { %v1186_v23 = vsel %vm933_vm4, %v1156_v40, %v1159_v19  ;;  %v4589_v53 = vadd.f32 %v670_v25, %v5266_v61  ;;  %v775_v12 = vrot.slane %v4573_v3, 7  ;;  %v1091_v62 = vsel %vm788_vm3, %v1061_v20, %v1064_v52 }
 0x22d   : > { %v1344_v54 = vadd.f32 %v1296_v58, %v4349_v32  ;;  %v1667_v27 = vmul.f32 %v2848_v57, %v1619_v4  ;;  %v1232_v11 = vadd.f32 %v1186_v23, %v4507_v46  ;;  %v1603_v8 = vand.u32 2147483647, %v1424_v24  ;;  %v5269_v4 = vld [vmem:[#allocation17_spill] sm:$0xff] }
 0x22e   : > { %v799_v40 = vsel %vm788_vm3, %v772_v49, %v775_v12  ;;  %v922_v17 = vrot.slane %v4573_v3, 1  ;;  %v1163_v43 = vrot.slane %v4589_v53, 1  ;;  %v1067_v46 = vrot.slane %v4589_v53, 7 }
 0x22f   : > { %v1790_v33 = vand.u32 2147483647, %v1344_v54  ;;  %v1280_v60 = vmul.f32 0.5, %v1232_v11  ;;  %v1651_v36 = vmul.f32 %v2848_v57, %v1603_v8  ;;  %v848_v32 = vadd.f32 %v801_v59, %v4526_v42  ;;  %v5271_v8 = vld [vmem:[#allocation52_spill] sm:$0xff] }
 0x230   : > { %v944_v20 = vsel %vm933_vm4, %v919_v35, %v922_v17  ;;  %v1184_v49 = vsel %vm933_vm4, %v1160_v34, %v1163_v43  ;;  %v1377_v16 = vmul.f32 9.0, %v5264_v44  ;;  %v1719_v13 = vadd.f32 %v4458_v51, %v1667_v27  ;;  %v5268_v34 = vld [vmem:[#allocation55_spill] sm:$0xff]  ;;  %v477_v44 = vpop.permute.xlu0 %476 }
 0x231   : > { %v1090_v31 = vsel %vm788_vm3, %v1060_v30, %v1063_v55  ;;  %v1328_v39 = vadd.f32 %v1280_v60, %v4402_v28  ;;  %v1009_v18 = vadd.f32 %v944_v20, %v864_v26  ;;  %v865_v35 = vadd.f32 %v799_v40, %v4573_v3 }
 0x232   : > { %v1249_v5 = vadd.f32 %v1184_v49, %v1091_v62  ;;  %v558_v6 = vadd.f32 %v475_v45, %v5267_v38  ;;  %v575_v25 = vadd.f32 %v509_v48, %v5268_v34  ;;  %v4627_v51 = vmul.f32 %v2848_v57, %v1790_v33  ;;  %v5270_v45 = vld [vmem:[#allocation26_spill] sm:$0xff]  ;;  %v5272_v38 = vld [vmem:[#allocation16_spill] sm:$0xff] }
 0x233   : > { %v4630_v58 = vadd.f32 %v4511_v14, %v1651_v36  ;;  %v1088_v28 = vsel %vm788_vm3, %v1064_v52, %v1067_v46  ;;  %v1441_v30 = vsub.f32 %v1393_v21, %v1009_v18  ;;  %v1774_v54 = vand.u32 2147483647, %v1328_v39 }
 0x234   : > { %v1297_v26 = vmul.f32 0.5, %v1249_v5  ;;  %v606_v59 = vadd.f32 %v558_v6, %v5269_v4  ;;  %v654_v24 = vmul.f32 0.5, %v558_v6  ;;  %v4638_v23 = vadd.f32 %v575_v25, %v5270_v45 }
 0x235   : > { %v1620_v27 = vand.u32 2147483647, %v1441_v30  ;;  %v671_v11 = vmul.f32 0.5, %v575_v25  ;;  %v559_v62 = vadd.f32 %v477_v44, %v5271_v8  ;;  %v1394_v60 = vmul.f32 9.0, %v5266_v61 }
 0x236   : > { %v1345_v14 = vadd.f32 %v1297_v26, %v4532_v9  ;;  %v4643_v40 = vadd.f32 %v654_v24, %v5269_v4  ;;  %v774_v33 = vrot.slane %v606_v59, 7  ;;  %v921_v52 = vrot.slane %v606_v59, 1 }
 0x237   : > { %v1668_v21 = vmul.f32 %v2848_v57, %v1620_v27  ;;  %v925_v36 = vrot.slane %v4638_v23, 1  ;;  %v1378_v48 = vmul.f32 9.0, %v5269_v4  ;;  %v4658_v39 = vadd.f32 %v671_v11, %v5270_v45 }
 0x238   : > { %v1791_v20 = vand.u32 2147483647, %v1345_v14  ;;  %v798_v49 = vsel %vm788_vm3, %v771_v2, %v774_v33  ;;  %v943_v9 = vsel %vm933_vm4, %v918_v7, %v921_v52  ;;  %v4661_v61 = vmul.f32 %v2848_v57, %v1774_v54 }
 0x239   : > { %v993_v18 = vadd.f32 %v943_v9, %v848_v32  ;;  %v1162_v5 = vrot.slane %v4643_v40, 1  ;;  %v4665_v6 = vadd.f32 %v559_v62, %v5272_v38  ;;  %v1720_v34 = vadd.f32 %v1719_v13, %v1668_v21  ;;  %v511_v9 = vpop.permute.xlu1 %510 }
 0x23a   : > { %v1066_v2 = vrot.slane %v4643_v40, 7  ;;  %v778_v42 = vrot.slane %v4638_v23, 7  ;;  %v941_v7 = vsel %vm933_vm4, %v922_v17, %v925_v36  ;;  %v849_v25 = vadd.f32 %v798_v49, %v606_v59 }
 0x23b   : > { %v1183_v32 = vsel %vm933_vm4, %v1159_v19, %v1162_v5  ;;  %v1425_v44 = vsub.f32 %v1377_v16, %v993_v18  ;;  %v1010_v30 = vadd.f32 %v941_v7, %v865_v35  ;;  %v1839_v26 = vmul.f32 %v2848_v57, %v1791_v20 }
 0x23c   : > { %v1233_v13 = vadd.f32 %v1183_v32, %v1090_v31  ;;  %v1166_v4 = vrot.slane %v4658_v39, 1  ;;  %v655_v24 = vmul.f32 0.5, %v559_v62  ;;  %v777_v11 = vrot.slane %v4665_v6, 7 }
 0x23d   : > { %v1604_v54 = vand.u32 2147483647, %v1425_v44  ;;  %v1442_v27 = vsub.f32 %v1394_v60, %v1010_v30  ;;  %v924_v17 = vrot.slane %v4665_v6, 1  ;;  %v1070_v8 = vrot.slane %v4658_v39, 7 }
 0x23e   : > { %v1281_v59 = vmul.f32 0.5, %v1233_v13  ;;  %v1181_v19 = vsel %vm933_vm4, %v1163_v43, %v1166_v4  ;;  %v4689_v16 = vadd.f32 %v655_v24, %v5272_v38  ;;  %v796_v35 = vsel %vm788_vm3, %v775_v12, %v778_v42 }
 0x23f   : > { %v1652_v31 = vmul.f32 %v2848_v57, %v1604_v54  ;;  %v1250_v62 = vadd.f32 %v1181_v19, %v1088_v28  ;;  %v1621_v14 = vand.u32 2147483647, %v1442_v27  ;;  %v795_v43 = vsel %vm788_vm3, %v774_v33, %v777_v11 }
 0x240   : > { %v1329_v21 = vadd.f32 %v1281_v59, %v4547_v37  ;;  %v940_v60 = vsel %vm933_vm4, %v921_v52, %v924_v17  ;;  %v1069_v20 = vrot.slane %v4689_v16, 7  ;;  %v1087_v3 = vsel %vm788_vm3, %v1063_v55, %v1066_v2  ;;  %v5274_v59 = vld [vmem:[#allocation31_spill] sm:$0xff] }
 0x241   : > { %v1298_v12 = vmul.f32 0.5, %v1250_v62  ;;  %v1669_v28 = vmul.f32 %v2848_v57, %v1621_v14  ;;  %v994_v49 = vadd.f32 %v940_v60, %v849_v25  ;;  %v866_v33 = vadd.f32 %v796_v35, %v4638_v23  ;;  %v5275_v14 = vld [vmem:[#allocation30_spill] sm:$0xff]  ;;  %v5282_v23 = vld [vmem:[#allocation93_spill] sm:$0xff] }
 0x242   : > { %v1775_v18 = vand.u32 2147483647, %v1329_v21  ;;  %v1085_v52 = vsel %vm788_vm3, %v1067_v46, %v1070_v8  ;;  %v1165_v37 = vrot.slane %v4689_v16, 1  ;;  %v1699_v7 = vadd.f32 %v4630_v58, %v1652_v31  ;;  %v5273_v58 = vld [vmem:[#allocation65_spill] sm:$0xff] }
 0x243   : > { %v1346_v55 = vadd.f32 %v1298_v12, %v4589_v53  ;;  %v4724_v32 = vadd.f32 %v795_v43, %v4665_v6  ;;  %v1426_v25 = vsub.f32 %v1378_v48, %v994_v49  ;;  %v4730_v44 = vsel %vm788_vm3, %v1066_v2, %v1069_v20 }
 0x244   : > { %v1180_v46 = vsel %vm933_vm4, %v1162_v5, %v1165_v37  ;;  %v1395_v30 = vmul.f32 9.0, %v5270_v45  ;;  %v576_v13 = vadd.f32 %v511_v9, %v5273_v58  ;;  %v1721_v53 = vadd.f32 %v1720_v34, %v1669_v28  ;;  %v5276_v28 = vld [vmem:[#allocation15_spill] sm:$0xff]  ;;  %v5277_v9 = vld [vmem:[#allocation18_spill] sm:$0xff] }
 0x245   : > { %v1792_v24 = vand.u32 2147483647, %v1346_v55  ;;  %v1234_v54 = vadd.f32 %v1180_v46, %v1087_v3  ;;  %v1605_v27 = vand.u32 2147483647, %v1426_v25  ;;  %v1823_v48 = vmul.f32 %v2848_v57, %v1775_v18  ;;  %v479_v55 = vpop.permute.xlu0 %478 }
 0x246   : > { %v1396_v19 = vmul.f32 9.0, %v5274_v59  ;;  %v624_v2 = vadd.f32 %v576_v13, %v5274_v59  ;;  %v672_v31 = vmul.f32 0.5, %v576_v13  ;;  %v4743_v5 = vmul.f32 9.0, %v5275_v14 }
 0x247   : > { %v1282_v35 = vmul.f32 0.5, %v1234_v54  ;;  %v1653_v62 = vmul.f32 %v2848_v57, %v1605_v27  ;;  %v1890_v45 = vadd.f32 %v4499_v29, %v4627_v51  ;;  %v4749_v60 = vmul.f32 9.0, %v5272_v38  ;;  %v5278_v29 = vld [vmem:[#allocation91_spill] sm:$0xff] }
 0x248   : > { %v720_v34 = vadd.f32 %v672_v31, %v5274_v59  ;;  %v781_v21 = vrot.slane %v624_v2, 7  ;;  %v928_v43 = vrot.slane %v624_v2, 1  ;;  %v1840_v3 = vmul.f32 %v2848_v57, %v1792_v24 }
 0x249   : > { %v1891_v12 = vadd.f32 %v1890_v45, %v1839_v26  ;;  %v4753_v49 = vmul.f32 9.0, %v5276_v28  ;;  %v4756_v18 = vmul.f32 9.0, %v5277_v9  ;;  %v1330_v25 = vadd.f32 %v1282_v35, %v4643_v40  ;;  %v5281_v35 = vld [vmem:[#allocation46_spill] sm:$0xff] }
 0x24a   : > { %v5279_v51 = vrot.slane %v5278_v29, 7  ;;  %v793_v38 = vsel %vm788_vm3, %v778_v42, %v781_v21  ;;  %v938_v26 = vsel %vm933_vm4, %v925_v36, %v928_v43  ;;  %v4771_v58 = vadd.f32 %v1699_v7, %v1653_v62  ;;  %v5283_v62 = vld [vmem:[#allocation92_spill] sm:$0xff] }
 0x24b   : > { %v867_v13 = vadd.f32 %v793_v38, %v624_v2  ;;  %v1011_v24 = vadd.f32 %v938_v26, %v866_v33  ;;  %v5280_v54 = vrot.slane %v5278_v29, 1  ;;  %v1073_v59 = vrot.slane %v720_v34, 7 }
 0x24c   : > { %v790_v46 = vsel %vm788_vm3, %v781_v21, %v5279_v51  ;;  %v1169_v31 = vrot.slane %v720_v34, 1  ;;  %v560_v42 = vadd.f32 %v479_v55, %v5281_v35  ;;  %v1892_v7 = vadd.f32 %v1891_v12, %v1840_v3  ;;  %v5286_v55 = vld [vmem:[#allocation94_spill] sm:$0xff] }
 0x24d   : > { %v868_v40 = vadd.f32 %v790_v46, %v5278_v29  ;;  %v935_v27 = vsel %vm933_vm4, %v928_v43, %v5280_v54  ;;  %v1443_v36 = vsub.f32 %v1395_v30, %v1011_v24  ;;  %v5284_v2 = vrot.slane %v5283_v62, 7 }
 0x24e   : > { %v1012_v14 = vadd.f32 %v935_v27, %v867_v13  ;;  %v1082_v21 = vsel %vm788_vm3, %v1070_v8, %v1073_v59  ;;  %v5285_v43 = vrot.slane %v5283_v62, 1  ;;  %v1178_v30 = vsel %vm933_vm4, %v1166_v4, %v1169_v31 }
 0x24f   : > { %v4780_v45 = vadd.f32 %v5282_v23, %v868_v40  ;;  %v1079_v33 = vsel %vm788_vm3, %v1073_v59, %v5284_v2  ;;  %v1251_v3 = vadd.f32 %v1178_v30, %v1085_v52  ;;  %v1776_v46 = vand.u32 2147483647, %v1330_v25  ;;  %v5289_v30 = vld [vmem:[#allocation43_spill] sm:$0xff] }
 0x250   : > { %v1175_v9 = vsel %vm933_vm4, %v1169_v31, %v5285_v43  ;;  %v1253_v29 = vadd.f32 %v5286_v55, %v1079_v33  ;;  %v1444_v51 = vsub.f32 %v1396_v19, %v1012_v14  ;;  %v1622_v38 = vand.u32 2147483647, %v1443_v36  ;;  %v5287_v14 = vld [vmem:[#allocation87_spill] sm:$0xff] }
 0x251   : > { %v1252_v12 = vadd.f32 %v1175_v9, %v1082_v21  ;;  %v1869_v8 = vadd.f32 %v4521_v22, %v4661_v61  ;;  %v608_v26 = vadd.f32 %v560_v42, %v5276_v28  ;;  %v1299_v13 = vmul.f32 0.5, %v1251_v3 }
 0x252   : > { %v1301_v24 = vmul.f32 0.5, %v1253_v29  ;;  %v1623_v54 = vand.u32 2147483647, %v1444_v51  ;;  %v1670_v27 = vmul.f32 %v2848_v57, %v1622_v38  ;;  %v656_v4 = vmul.f32 0.5, %v560_v42  ;;  %v5291_v29 = vld [vmem:[#allocation89_spill] sm:$0xff] }
 0x253   : > { %v1300_v40 = vmul.f32 0.5, %v1252_v12  ;;  %v4803_v59 = vadd.f32 %v1869_v8, %v1823_v48  ;;  %v780_v52 = vrot.slane %v608_v26, 7  ;;  %v1347_v31 = vadd.f32 %v1299_v13, %v4658_v39 }
 0x254   : > { %v4807_v25 = vadd.f32 %v1301_v24, %v5283_v62  ;;  %v1671_v22 = vmul.f32 %v2848_v57, %v1623_v54  ;;  %v1722_v61 = vadd.f32 %v1721_v53, %v1670_v27  ;;  %v704_v35 = vadd.f32 %v656_v4, %v5276_v28  ;;  %v5295_v27 = vld [vmem:[#allocation90_spill] sm:$0xff] }
 0x255   : > { %v1348_v19 = vadd.f32 %v1300_v40, %v720_v34  ;;  %v5288_v23 = vrot.slane %v5287_v14, 7  ;;  %v792_v48 = vsel %vm788_vm3, %v777_v11, %v780_v52  ;;  %v1793_v39 = vand.u32 2147483647, %v1347_v31 }
 0x256   : > { %v1824_v42 = vmul.f32 %v2848_v57, %v1776_v46  ;;  %v851_v62 = vadd.f32 %v792_v48, %v608_v26  ;;  %v4820_v2 = vadd.f32 %v1722_v61, %v1671_v22  ;;  %v927_v28 = vrot.slane %v608_v26, 1  ;;  %v5292_v46 = vld [vmem:[#allocation88_spill] sm:$0xff] }
 0x257   : > { %v789_v36 = vsel %vm788_vm3, %v780_v52, %v5288_v23  ;;  %v1794_v34 = vand.u32 2147483647, %v1348_v19  ;;  %v1072_v33 = vrot.slane %v704_v35, 7  ;;  %v1841_v21 = vmul.f32 %v2848_v57, %v1793_v39 }
 0x258   : > { %v852_v53 = vadd.f32 %v789_v36, %v5287_v14  ;;  %v1168_v9 = vrot.slane %v704_v35, 1  ;;  %v1413_v3 = vmul.f32 9.0, %v5289_v30  ;;  %v5290_v11 = vrot.slane %v5287_v14, 1 }
 0x259   : > { %v1842_v43 = vmul.f32 %v2848_v57, %v1794_v34  ;;  %v937_v55 = vsel %vm933_vm4, %v924_v17, %v927_v28  ;;  %v5293_v38 = vrot.slane %v5292_v46, 7  ;;  %v1893_v26 = vadd.f32 %v1892_v7, %v1841_v21 }
 0x25a   : > { %v934_v12 = vsel %vm933_vm4, %v927_v28, %v5290_v11  ;;  %v997_v51 = vadd.f32 %v5291_v29, %v852_v53  ;;  %v995_v13 = vadd.f32 %v937_v55, %v4724_v32  ;;  %v1081_v24 = vsel %vm788_vm3, %v1069_v20, %v1072_v33 }
 0x25b   : > { %v1078_v8 = vsel %vm788_vm3, %v1072_v33, %v5293_v38  ;;  %v996_v40 = vadd.f32 %v934_v12, %v851_v62  ;;  %v5294_v6 = vrot.slane %v5292_v46, 1  ;;  %v1177_v54 = vsel %vm933_vm4, %v1165_v37, %v1168_v9 }
 0x25c   : > { %v1237_v7 = vadd.f32 %v5295_v27, %v1078_v8  ;;  %v1429_v32 = vsub.f32 %v4756_v18, %v997_v51  ;;  %v1894_v4 = vadd.f32 %v1893_v26, %v1842_v43  ;;  %v1235_v52 = vadd.f32 %v1177_v54, %v4730_v44 }
 0x25d   : > { %v1174_v17 = vsel %vm933_vm4, %v1168_v9, %v5294_v6  ;;  %v1427_v20 = vsub.f32 %v4749_v60, %v995_v13  ;;  %v1445_v19 = vsub.f32 %v4743_v5, %v4780_v45  ;;  %v1428_v61 = vsub.f32 %v4753_v49, %v996_v40 }
 0x25e   : > { %v1236_v31 = vadd.f32 %v1174_v17, %v1081_v24  ;;  %v1285_v22 = vmul.f32 0.5, %v1237_v7  ;;  %v1461_v14 = vsub.f32 %v1413_v3, %v4479_v56  ;;  %v1283_v23 = vmul.f32 0.5, %v1235_v52 }
 0x25f   : > { %v1606_v36 = vand.u32 2147483647, %v1427_v20  ;;  %v1476_v48 = vadd.s32 120, %v2815_v10  ;;  %v1607_v39 = vand.u32 2147483647, %v1428_v61  ;;  %v1742_v60 = vadd.f32 %v4270_v41, %v4408_v63 }
 0x260   : > { %v1284_v37 = vmul.f32 0.5, %v1236_v31  ;;  %v1333_v18 = vadd.f32 %v1285_v22, %v5292_v46  ;;  %v1608_v44 = vand.u32 2147483647, %v1429_v32  ;;  %v1331_v34 = vadd.f32 %v1283_v23, %v4689_v16 }
 0x261   : > { %v1654_v45 = vmul.f32 %v2848_v57, %v1606_v36  ;;  %vm1510_vm8 = vcmp.le.s32.totalorder %v1476_v48, 126  ;;  %v1624_v49 = vand.u32 2147483647, %v1445_v19  ;;  %v1655_v56 = vmul.f32 %v2848_v57, %v1607_v39 }
 0x262   : > { %v1332_v5 = vadd.f32 %v1284_v37, %v704_v35  ;;  %vm1543_vm9 = vmand %vm1510_vm8, %vm1527_vm0  ;;  %v1640_v10 = vand.u32 2147483647, %v1461_v14  ;;  %v1743_v53 = vadd.f32 %v1742_v60, %v4529_v50  ;;  %v1795_v28 = vand.u32 2147483647, %v4807_v25 }
 0x263   : > { %v1701_v33 = vadd.f32 %v4771_v58, %v1654_v45  ;;  %v1777_v41 = vand.u32 2147483647, %v1331_v34  ;;  %vm1560_vm10 = vmand %vm1543_vm9, %vm1544_vm1  ;;  %v1871_v16 = vadd.f32 %v4803_v59, %v1824_v42  ;;  %v5297_v35 = vmov 0.0  }
 0x264   : > { %v1778_v63 = vand.u32 2147483647, %v1332_v5  ;;  %v2048_v21 = vsel %vm1560_vm10, 1.0, %v5297_v35  ;;  %v1744_v43 = vadd.f32 %v1743_v53, %v4535_v0  ;;  %v1365_v9 = vadd.f32 %v4513_v1, %v5255_v15 }
 0x265   : > { %v1702_v30 = vadd.f32 %v1701_v33, %v1655_v56  ;;  %v1779_v50 = vand.u32 2147483647, %v1333_v18  ;;  %v1825_v25 = vmul.f32 %v2848_v57, %v1777_v41  ;;  %v1656_v3 = vmul.f32 %v2048_v21, %v1608_v44 }
 0x266   : > { %v1672_v58 = vmul.f32 %v2048_v21, %v1624_v49  ;;  %v1688_v11 = vmul.f32 %v2048_v21, %v1640_v10  ;;  %v1811_v12 = vand.u32 2147483647, %v1365_v9  ;;  %v1826_v55 = vmul.f32 %v2848_v57, %v1778_v63 }
 0x267   : > { %v1872_v29 = vadd.f32 %v1871_v16, %v1825_v25  ;;  %v1703_v51 = vadd.f32 %v1702_v30, %v1656_v3  ;;  %v1843_v59 = vmul.f32 %v2048_v21, %v1795_v28  ;;  %v1827_v15 = vmul.f32 %v2048_v21, %v1779_v50 }
 0x268   : > { %v1724_v42 = vadd.f32 %v4820_v2, %v1672_v58  ;;  %v1745_v46 = vadd.f32 %v1744_v43, %v1688_v11  ;;  %v1859_v0 = vmul.f32 %v2048_v21, %v1811_v12 }
 0x269   : > { %v1873_v38 = vadd.f32 %v1872_v29, %v1826_v55  ;;  %v1704_v8 = vrot.slane %v1703_v51, 4  ;;  %v1895_v1 = vadd.f32 %v1894_v4, %v1843_v59 }
 0x26a   : > { %v1725_v26 = vrot.slane %v1724_v42, 4  ;;  %v1746_v13 = vrot.slane %v1745_v46, 4  ;;  %v1916_v40 = vadd.f32 %v4567_v47, %v1859_v0 }
 0x26b   : > { %v1705_v24 = vadd.f32 %v1704_v8, %v1703_v51  ;;  %v1874_v6 = vadd.f32 %v1873_v38, %v1827_v15  ;;  %v1896_v17 = vrot.slane %v1895_v1, 4 }
 0x26c   : > { %v1726_v54 = vadd.f32 %v1725_v26, %v1724_v42  ;;  %v1747_v57 = vadd.f32 %v1746_v13, %v1745_v46  ;;  %v1917_v27 = vrot.slane %v1916_v40, 4 }
 0x26d   : > { %v1706_v7 = vrot.slane %v1705_v24, 2  ;;  %v1875_v32 = vrot.slane %v1874_v6, 4  ;;  %v1897_v52 = vadd.f32 %v1896_v17, %v1895_v1 }
 0x26e   : > { %v1727_v2 = vrot.slane %v1726_v54, 2  ;;  %v1748_v31 = vrot.slane %v1747_v57, 2  ;;  %v1918_v20 = vadd.f32 %v1917_v27, %v1916_v40 }
 0x26f   : > { %v1707_v19 = vadd.f32 %v1706_v7, %v1705_v24  ;;  %v1876_v22 = vadd.f32 %v1875_v32, %v1874_v6  ;;  %v1898_v61 = vrot.slane %v1897_v52, 2 }
 0x270   : > { %v1728_v4 = vadd.f32 %v1727_v2, %v1726_v54  ;;  %v1749_v14 = vadd.f32 %v1748_v31, %v1747_v57  ;;  %v1919_v23 = vrot.slane %v1918_v20, 2 }
 0x271   : > { %v1708_v37 = vrot.slane %v1707_v19, 1  ;;  %v1877_v47 = vrot.slane %v1876_v22, 2  ;;  %v1899_v36 = vadd.f32 %v1898_v61, %v1897_v52 }
 0x272   : > { %v1729_v48 = vrot.slane %v1728_v4, 1  ;;  %v1750_v18 = vrot.slane %v1749_v14, 1  ;;  %v1920_v39 = vadd.f32 %v1919_v23, %v1918_v20 }
 0x273   : > { %v1709_v44 = vadd.f32 %v1708_v37, %v1707_v19  ;;  %v1878_v60 = vadd.f32 %v1877_v47, %v1876_v22  ;;  %v1900_v34 = vrot.slane %v1899_v36, 1 }
 0x274   : > { %v1730_v5 = vadd.f32 %v1729_v48, %v1728_v4  ;;  %v1921_v45 = vrot.slane %v1920_v39, 1  ;;  %v1751_v49 = vadd.f32 %v1750_v18, %v1749_v14 }
 0x275   : > { %v1879_v56 = vrot.slane %v1878_v60, 1  ;;  %v1901_v62 = vadd.f32 %v1900_v34, %v1899_v36 }
 0x276   : > { %v1756_v10 = vsel %vm1755_vm11, %v1730_v5, %v1709_v44  ;;  %v1922_v41 = vadd.f32 %v1921_v45, %v1920_v39 }
 0x277   : > { %v1758_v53 = vsel %vm1757_vm12, %v1751_v49, %v1756_v10  ;;  %v1880_v28 = vadd.f32 %v1879_v56, %v1878_v60 }
 0x278   : > { %v1761_v33 = vsel %vm1760_vm13, %v1758_v53, 0.0 }
 0x279   : > { %1762 = vadd.xlane.f32.xlu0 %v1761_v33  ;;  %v1926_v63 = vsel %vm1755_vm11, %v1901_v62, %v1880_v28 }
 0x27a   : > { %v1927_v16 = vsel %vm1757_vm12, %v1922_v41, %v1926_v63 }
 0x27b   : > { %v1929_v35 = vsel %vm1760_vm13, %v1927_v16, 0.0 }
 0x27c   : > { %1930 = vadd.xlane.f32.xlu1 %v1929_v35 }
 0x2ec   : > { %v1763_v21 = vpop.xlane.xlu0 %1762 }
 0x2ef   : > { %v1931_v43 = vpop.xlane.xlu1 %1930 }
 0x2f0   : > { %v1933_v9 = vsel %vm1932_vm14, %v1763_v21, %v1931_v43 }
 0x2f1   : > { %1935 = vst.msk [vmem:[%s209_s25] sm:$0x7] %vm1934_vm15, %v1933_v9 }
 0x2f2 PF: > { %p15_p8 = scmp.ge.s32.totalorder %s2251_s14, 4   ;;  %s5298_s9 = smov %s2199_s10 }
 0x2f3   : > { %s5299_s10 = smov %s2203_s11  ;;  %s5300_s11 = smov %s2261_s17 }
 0x2f4   : > { %s5301_s12 = smov %s2251_s14  ;;  %17 = sbr.rel (!%p15_p8) target bundleno = 5 (0x5), region = 81 }
 0x2f9   :  { %1955 = vsyncpa [#allocation3], 1 }
 0x2fa   :  { %1957 = vsyncpa [#allocation3 + $0x1], 1 }
 0x2fb   :  { %1958 = vsyncpa [#allocation5], 1 }
 0x2fc   :  { %1960 = vsyncpa [#allocation5 + $0x1], 1 }

</bundles_post_ra>
